<compile_context>
chip_gen: v5e
topology: v5e:2x2
jax: 0.10.0
libtpu: 0.0.40
codegen_flags: <defaults>
</compile_context>

<pallas_src>
import jax
import jax.numpy as jnp
from jax.experimental import pallas as pl
from jax.experimental.pallas import tpu as pltpu

# ----------------------------- small ESM2 config ------------------------------
NUM_LAYERS = 2
EMBED_DIM = 32
NUM_HEADS = 4
HEAD_DIM = EMBED_DIM // NUM_HEADS
FFN_DIM = 4 * EMBED_DIM
ALPHABET_SIZE = 33          # ESM-1b alphabet
VOCAB_PAD = max(128, ((ALPHABET_SIZE + 127) // 128) * 128)   # lane-dense logits
PADDING_IDX = 1
CLS_IDX = 0
EOS_IDX = 2
MASK_IDX = 32
LN_EPS = 1e-5
NEG_INF = -1e30             # semantics-equivalent to PyTorch's -inf masked_fill


# ------------------------------ fused Pallas kernel ---------------------------
def _esm2_fused_kernel(x_ref, pad_ref, cos_ref, sin_ref, rot_ref,
                       wqkv_ref, bqkv_ref, wo_ref, bo_ref,
                       ln1g_ref, ln1b_ref, ln2g_ref, ln2b_ref,
                       w1_ref, b1_ref, w2_ref, b2_ref,
                       lnag_ref, lnab_ref,
                       lmdw_ref, lmdb_ref, lmlg_ref, lmlb_ref,
                       vocw_ref, vocb_ref,
                       out_ref):
    E, Dh, H = EMBED_DIM, HEAD_DIM, NUM_HEADS

    x = x_ref[...]                  # [T, E] f32 activations for this batch element
    pad = pad_ref[0]                # [1, T] 1.0 where key token is padding
    cos = cos_ref[...]              # [T, E] f32 (rotary table tiled over heads)
    sin = sin_ref[...]
    rot = rot_ref[...]              # [E, E] bf16 signed block-diag rotate_half matrix

    def mm(a, w):
        # bf16 MXU inputs, f32 accumulation
        return jnp.dot(a.astype(jnp.bfloat16), w, preferred_element_type=jnp.float32)

    def ln(a, g, b):
        mu = jnp.mean(a, axis=-1, keepdims=True)
        c = a - mu
        var = jnp.mean(c * c, axis=-1, keepdims=True)    # biased var (PyTorch LayerNorm)
        return c * jax.lax.rsqrt(var + LN_EPS) * g + b

    def erf(a):
        # Abramowitz & Stegun 7.1.26, max abs err ~1.5e-7 (erf lowering on Mosaic
        # is not guaranteed, so use exp/abs/where only).
        p_ = 0.3275911
        a1, a2, a3, a4, a5 = 0.254829592, -0.284496736, 1.421413741, -1.453152027, 1.061405429
        sgn = jnp.where(a >= 0.0, 1.0, -1.0)
        z = jnp.abs(a)
        t = 1.0 / (1.0 + p_ * z)
        poly = t * (a1 + t * (a2 + t * (a3 + t * (a4 + t * a5))))
        return sgn * (1.0 - poly * jnp.exp(-z * z))

    def gelu(a):
        return 0.5 * a * (1.0 + erf(a * 0.7071067811865476))

    for l in range(NUM_LAYERS):
        # ------------------ self-attention block (pre-LN) ---------------------
        h = ln(x, ln1g_ref[l], ln1b_ref[l])
        qkv = mm(h, wqkv_ref[l]) + bqkv_ref[l]           # [T, 3E]; q pre-scaled in weights
        q = qkv[:, :E]
        k = qkv[:, E:2 * E]
        v = qkv[:, 2 * E:]

        # rotary embedding: x*cos + rotate_half(x)*sin; rotate_half via q @ R
        q = q * cos + mm(q, rot) * sin
        k = k * cos + mm(k, rot) * sin

        ctx = []
        for head in range(H):
            sl = slice(head * Dh, (head + 1) * Dh)
            qh = q[:, sl].astype(jnp.bfloat16)           # [T, Dh]
            kh = k[:, sl].astype(jnp.bfloat16)
            vh = v[:, sl].astype(jnp.bfloat16)
            s = jax.lax.dot_general(qh, kh, (((1,), (1,)), ((), ())),
                                    preferred_element_type=jnp.float32)   # [T, T]
            s = jnp.where(pad > 0.5, NEG_INF, s)         # mask padded keys
            m = jnp.max(s, axis=-1, keepdims=True)
            e = jnp.exp(s - m)
            p = e / jnp.sum(e, axis=-1, keepdims=True)
            ctx.append(jnp.dot(p.astype(jnp.bfloat16), vh,
                               preferred_element_type=jnp.float32))       # [T, Dh]
        ctx = jnp.concatenate(ctx, axis=-1)              # [T, E]
        x = x + mm(ctx, wo_ref[l]) + bo_ref[l]

        # ------------------------ feed-forward block --------------------------
        h = ln(x, ln2g_ref[l], ln2b_ref[l])
        h = gelu(mm(h, w1_ref[l]) + b1_ref[l])           # [T, FFN]
        x = x + mm(h, w2_ref[l]) + b2_ref[l]

    # --------- final LayerNorm + RobertaLMHead (lane-padded vocab proj) -------
    xf = ln(x, lnag_ref[...], lnab_ref[...])
    hh = gelu(mm(xf, lmdw_ref[...]) + lmdb_ref[...])
    hh = ln(hh, lmlg_ref[...], lmlb_ref[...])
    out_ref[...] = mm(hh, vocw_ref[...]) + vocb_ref[...]  # [T, VOCAB_PAD] lane-dense


# ------------------------------ parameter init --------------------------------
def init_params(key):
    def nrm(k, shape, scale=0.02):
        return scale * jax.random.normal(k, shape, dtype=jnp.float32)

    keys = iter(jax.random.split(key, 8 + NUM_LAYERS * 16))

    embed = nrm(next(keys), (ALPHABET_SIZE, EMBED_DIM))
    embed = embed.at[PADDING_IDX].set(0.0)     # nn.Embedding(padding_idx=...) zeroes this row

    layers = []
    for _ in range(NUM_LAYERS):
        layers.append(dict(
            ln1_g=jnp.ones((EMBED_DIM,), jnp.float32),
            ln1_b=jnp.zeros((EMBED_DIM,), jnp.float32),
            wq=nrm(next(keys), (EMBED_DIM, EMBED_DIM)), bq=nrm(next(keys), (EMBED_DIM,)),
            wk=nrm(next(keys), (EMBED_DIM, EMBED_DIM)), bk=nrm(next(keys), (EMBED_DIM,)),
            wv=nrm(next(keys), (EMBED_DIM, EMBED_DIM)), bv=nrm(next(keys), (EMBED_DIM,)),
            wo=nrm(next(keys), (EMBED_DIM, EMBED_DIM)), bo=nrm(next(keys), (EMBED_DIM,)),
            ln2_g=jnp.ones((EMBED_DIM,), jnp.float32),
            ln2_b=jnp.zeros((EMBED_DIM,), jnp.float32),
            w1=nrm(next(keys), (EMBED_DIM, FFN_DIM)), b1=nrm(next(keys), (FFN_DIM,)),
            w2=nrm(next(keys), (FFN_DIM, EMBED_DIM)), b2=nrm(next(keys), (EMBED_DIM,)),
        ))

    return dict(
        embed=embed,
        layers=layers,
        ln_after_g=jnp.ones((EMBED_DIM,), jnp.float32),
        ln_after_b=jnp.zeros((EMBED_DIM,), jnp.float32),
        lm_dense_w=nrm(next(keys), (EMBED_DIM, EMBED_DIM)),
        lm_dense_b=nrm(next(keys), (EMBED_DIM,)),
        lm_ln_g=jnp.ones((EMBED_DIM,), jnp.float32),
        lm_ln_b=jnp.zeros((EMBED_DIM,), jnp.float32),
        lm_bias=jnp.zeros((ALPHABET_SIZE,), jnp.float32),
    )


def prepare_params(params):
    """One-time packing: fuse QKV (q-scale folded in), stack layers, cast weights
    to bf16, build rotate_half permutation matrix, pad + transpose tied vocab proj."""
    E, H, Dh = EMBED_DIM, NUM_HEADS, HEAD_DIM
    scale = Dh ** -0.5
    bf = lambda a: a.astype(jnp.bfloat16)
    stack = lambda xs: jnp.stack(xs, axis=0)

    wqkv, bqkv, wo, bo = [], [], [], []
    ln1g, ln1b, ln2g, ln2b = [], [], [], []
    w1, b1, w2, b2 = [], [], [], []
    for lp in params['layers']:
        wqkv.append(jnp.concatenate([lp['wq'] * scale, lp['wk'], lp['wv']], axis=1))
        bqkv.append(jnp.concatenate([lp['bq'] * scale, lp['bk'], lp['bv']], axis=0)[None, :])
        wo.append(lp['wo']); bo.append(lp['bo'][None, :])
        ln1g.append(lp['ln1_g'][None, :]); ln1b.append(lp['ln1_b'][None, :])
        ln2g.append(lp['ln2_g'][None, :]); ln2b.append(lp['ln2_b'][None, :])
        w1.append(lp['w1']); b1.append(lp['b1'][None, :])
        w2.append(lp['w2']); b2.append(lp['b2'][None, :])

    # rotate_half as a signed permutation: rotate_half(x) == x @ rot
    d2 = Dh // 2
    zero = jnp.zeros((d2, d2), jnp.float32)
    eye = jnp.eye(d2, dtype=jnp.float32)
    r_head = jnp.concatenate(
        [jnp.concatenate([zero, eye], axis=1),
         jnp.concatenate([-eye, zero], axis=1)], axis=0)            # [Dh, Dh]
    rot = jnp.kron(jnp.eye(H, dtype=jnp.float32), r_head)           # [E, E] block-diag

    # tied vocab projection, pre-transposed and lane-padded to 128
    voc_w = jnp.zeros((E, VOCAB_PAD), jnp.float32).at[:, :ALPHABET_SIZE].set(params['embed'].T)
    voc_b = jnp.zeros((1, VOCAB_PAD), jnp.float32).at[0, :ALPHABET_SIZE].set(params['lm_bias'])

    return dict(
        embed=params['embed'],
        rot=bf(rot),
        wqkv=bf(stack(wqkv)), bqkv=stack(bqkv),
        wo=bf(stack(wo)), bo=stack(bo),
        ln1_g=stack(ln1g), ln1_b=stack(ln1b),
        ln2_g=stack(ln2g), ln2_b=stack(ln2b),
        w1=bf(stack(w1)), b1=stack(b1),
        w2=bf(stack(w2)), b2=stack(b2),
        ln_after_g=params['ln_after_g'][None, :], ln_after_b=params['ln_after_b'][None, :],
        lm_dense_w=bf(params['lm_dense_w']), lm_dense_b=params['lm_dense_b'][None, :],
        lm_ln_g=params['lm_ln_g'][None, :], lm_ln_b=params['lm_ln_b'][None, :],
        voc_w=bf(voc_w), voc_b=voc_b,
    )


def _rotary_tables(T):
    # ESM RotaryEmbedding over full head_dim, tiled across heads to [T, E]
    inv_freq = 1.0 / (10000.0 ** (jnp.arange(0, HEAD_DIM, 2, dtype=jnp.float32) / HEAD_DIM))
    t = jnp.arange(T, dtype=jnp.float32)
    freqs = t[:, None] * inv_freq[None, :]
    emb = jnp.concatenate([freqs, freqs], axis=-1)                  # [T, Dh]
    cos = jnp.tile(jnp.cos(emb), (1, NUM_HEADS))                    # [T, E]
    sin = jnp.tile(jnp.sin(emb), (1, NUM_HEADS))
    return cos, sin


# -------------------------------- forward pass --------------------------------
def esm2_forward(tokens, prep):
    B, T = tokens.shape
    E = EMBED_DIM

    padding_mask = (tokens == PADDING_IDX)                          # [B, T] bool
    # embedding (embed_scale = 1, token_dropout forced False in __init__)
    x = jnp.take(prep['embed'], tokens, axis=0)                     # [B, T, E]
    x = x * (1.0 - padding_mask[..., None].astype(x.dtype))
    x = x.reshape(B * T, E)
    pad_f = padding_mask.astype(jnp.float32)[:, None, :]            # [B, 1, T]

    cos, sin = _rotary_tables(T)

    consts = (cos, sin, prep['rot'],
              prep['wqkv'], prep['bqkv'], prep['wo'], prep['bo'],
              prep['ln1_g'], prep['ln1_b'], prep['ln2_g'], prep['ln2_b'],
              prep['w1'], prep['b1'], prep['w2'], prep['b2'],
              prep['ln_after_g'], prep['ln_after_b'],
              prep['lm_dense_w'], prep['lm_dense_b'],
              prep['lm_ln_g'], prep['lm_ln_b'],
              prep['voc_w'], prep['voc_b'])

    def cspec(a):   # whole-array block, same block every grid step (DMA'd once)
        return pl.BlockSpec(a.shape, lambda b, nd=a.ndim: (0,) * nd)

    in_specs = ([pl.BlockSpec((T, E), lambda b: (b, 0)),            # per-batch activations
                 pl.BlockSpec((1, 1, T), lambda b: (b, 0, 0))]      # per-batch key padding
                + [cspec(a) for a in consts])

    logits_pad = pl.pallas_call(
        _esm2_fused_kernel,
        out_shape=jax.ShapeDtypeStruct((B * T, VOCAB_PAD), jnp.float32),
        grid=(B,),
        in_specs=in_specs,
        out_specs=pl.BlockSpec((T, VOCAB_PAD), lambda b: (b, 0)),
        compiler_params=pltpu.CompilerParams(
            dimension_semantics=("parallel",)),                     # 2 TCs on v7x
    )(x, pad_f, *consts)

    logits = logits_pad[:, :ALPHABET_SIZE].reshape(B, T, ALPHABET_SIZE)

    # TODO(synk): attentions stacking + ContactPredictionHead only run when
    # need_head_weights / return_contacts=True; default forward path omits them.
    return {'logits': logits, 'representations': {}}


# ----------------------------------- main --------------------------------------
if __name__ == "__main__":
    key = jax.random.PRNGKey(0)
    pkey, tkey = jax.random.split(key)
    params = init_params(pkey)
    prep = prepare_params(params)

    B, T = 2, 8
    # tokens: [cls, amino acids..., eos, padding...]
    tokens = jax.random.randint(tkey, (B, T), 4, 24, dtype=jnp.int32)
    tokens = tokens.at[:, 0].set(CLS_IDX)
    tokens = tokens.at[0, T - 1].set(EOS_IDX)
    tokens = tokens.at[1, 5].set(EOS_IDX)
    tokens = tokens.at[1, 6:].set(PADDING_IDX)

    fwd = jax.jit(esm2_forward)
    out = fwd(tokens, prep)
    logits = jax.block_until_ready(out['logits'])

    assert logits.shape == (B, T, ALPHABET_SIZE), logits.shape
    assert bool(jnp.all(jnp.isfinite(logits)))
    print("KERNEL_OK")
</pallas_src>

<mosaic_0001>
module attributes {stable_mosaic.version = 11 : i64} {
  func.func @_esm2_fused_kernel(%arg0: i32, %arg1: memref<8x32xf32, #tpu.memory_space<vmem>>, %arg2: memref<1x1x8xf32, #tpu.memory_space<vmem>>, %arg3: memref<8x32xf32, #tpu.memory_space<vmem>>, %arg4: memref<8x32xf32, #tpu.memory_space<vmem>>, %arg5: memref<32x32xbf16, #tpu.memory_space<vmem>>, %arg6: memref<2x32x96xbf16, #tpu.memory_space<vmem>>, %arg7: memref<2x1x96xf32, #tpu.memory_space<vmem>>, %arg8: memref<2x32x32xbf16, #tpu.memory_space<vmem>>, %arg9: memref<2x1x32xf32, #tpu.memory_space<vmem>>, %arg10: memref<2x1x32xf32, #tpu.memory_space<vmem>>, %arg11: memref<2x1x32xf32, #tpu.memory_space<vmem>>, %arg12: memref<2x1x32xf32, #tpu.memory_space<vmem>>, %arg13: memref<2x1x32xf32, #tpu.memory_space<vmem>>, %arg14: memref<2x32x128xbf16, #tpu.memory_space<vmem>>, %arg15: memref<2x1x128xf32, #tpu.memory_space<vmem>>, %arg16: memref<2x128x32xbf16, #tpu.memory_space<vmem>>, %arg17: memref<2x1x32xf32, #tpu.memory_space<vmem>>, %arg18: memref<1x32xf32, #tpu.memory_space<vmem>>, %arg19: memref<1x32xf32, #tpu.memory_space<vmem>>, %arg20: memref<32x32xbf16, #tpu.memory_space<vmem>>, %arg21: memref<1x32xf32, #tpu.memory_space<vmem>>, %arg22: memref<1x32xf32, #tpu.memory_space<vmem>>, %arg23: memref<1x32xf32, #tpu.memory_space<vmem>>, %arg24: memref<32x128xbf16, #tpu.memory_space<vmem>>, %arg25: memref<1x128xf32, #tpu.memory_space<vmem>>, %arg26: memref<8x128xf32, #tpu.memory_space<vmem>>) attributes {dimension_semantics = [#tpu.dimension_semantics<parallel>], iteration_bounds = array<i64: 2>, scalar_prefetch = 0 : i64, scratch_operands = 0 : i64, tpu.core_type = #tpu.core_type<tc>, window_params = [{transform_indices = @transform_0, window_bounds = array<i64: 8, 32>}, {transform_indices = @transform_1, window_bounds = array<i64: 1, 1, 8>}, {pipeline_mode = #tpu.pipeline_mode<synchronous>, transform_indices = @transform_2, window_bounds = array<i64: 8, 32>}, {pipeline_mode = #tpu.pipeline_mode<synchronous>, transform_indices = @transform_3, window_bounds = array<i64: 8, 32>}, {pipeline_mode = #tpu.pipeline_mode<synchronous>, transform_indices = @transform_4, window_bounds = array<i64: 32, 32>}, {pipeline_mode = #tpu.pipeline_mode<synchronous>, transform_indices = @transform_5, window_bounds = array<i64: 2, 32, 96>}, {pipeline_mode = #tpu.pipeline_mode<synchronous>, transform_indices = @transform_6, window_bounds = array<i64: 2, 1, 96>}, {pipeline_mode = #tpu.pipeline_mode<synchronous>, transform_indices = @transform_7, window_bounds = array<i64: 2, 32, 32>}, {pipeline_mode = #tpu.pipeline_mode<synchronous>, transform_indices = @transform_8, window_bounds = array<i64: 2, 1, 32>}, {pipeline_mode = #tpu.pipeline_mode<synchronous>, transform_indices = @transform_9, window_bounds = array<i64: 2, 1, 32>}, {pipeline_mode = #tpu.pipeline_mode<synchronous>, transform_indices = @transform_10, window_bounds = array<i64: 2, 1, 32>}, {pipeline_mode = #tpu.pipeline_mode<synchronous>, transform_indices = @transform_11, window_bounds = array<i64: 2, 1, 32>}, {pipeline_mode = #tpu.pipeline_mode<synchronous>, transform_indices = @transform_12, window_bounds = array<i64: 2, 1, 32>}, {pipeline_mode = #tpu.pipeline_mode<synchronous>, transform_indices = @transform_13, window_bounds = array<i64: 2, 32, 128>}, {pipeline_mode = #tpu.pipeline_mode<synchronous>, transform_indices = @transform_14, window_bounds = array<i64: 2, 1, 128>}, {pipeline_mode = #tpu.pipeline_mode<synchronous>, transform_indices = @transform_15, window_bounds = array<i64: 2, 128, 32>}, {pipeline_mode = #tpu.pipeline_mode<synchronous>, transform_indices = @transform_16, window_bounds = array<i64: 2, 1, 32>}, {pipeline_mode = #tpu.pipeline_mode<synchronous>, transform_indices = @transform_17, window_bounds = array<i64: 1, 32>}, {pipeline_mode = #tpu.pipeline_mode<synchronous>, transform_indices = @transform_18, window_bounds = array<i64: 1, 32>}, {pipeline_mode = #tpu.pipeline_mode<synchronous>, transform_indices = @transform_19, window_bounds = array<i64: 32, 32>}, {pipeline_mode = #tpu.pipeline_mode<synchronous>, transform_indices = @transform_20, window_bounds = array<i64: 1, 32>}, {pipeline_mode = #tpu.pipeline_mode<synchronous>, transform_indices = @transform_21, window_bounds = array<i64: 1, 32>}, {pipeline_mode = #tpu.pipeline_mode<synchronous>, transform_indices = @transform_22, window_bounds = array<i64: 1, 32>}, {pipeline_mode = #tpu.pipeline_mode<synchronous>, transform_indices = @transform_23, window_bounds = array<i64: 32, 128>}, {pipeline_mode = #tpu.pipeline_mode<synchronous>, transform_indices = @transform_24, window_bounds = array<i64: 1, 128>}, {transform_indices = @transform_25, window_bounds = array<i64: 8, 128>}]} {
    %c0 = arith.constant 0 : index
    %c0_0 = arith.constant 0 : index
    %0 = vector.load %arg1[%c0, %c0_0] : memref<8x32xf32, #tpu.memory_space<vmem>>, vector<8x32xf32>
    %c0_1 = arith.constant 0 : index
    %c0_2 = arith.constant 0 : index
    %c0_3 = arith.constant 0 : index
    %1 = vector.load %arg2[%c0_1, %c0_2, %c0_3] : memref<1x1x8xf32, #tpu.memory_space<vmem>>, vector<1x1x8xf32>
    %2 = vector.shape_cast %1 : vector<1x1x8xf32> to vector<1x8xf32>
    %c0_4 = arith.constant 0 : index
    %c0_5 = arith.constant 0 : index
    %3 = vector.load %arg3[%c0_4, %c0_5] : memref<8x32xf32, #tpu.memory_space<vmem>>, vector<8x32xf32>
    %c0_6 = arith.constant 0 : index
    %c0_7 = arith.constant 0 : index
    %4 = vector.load %arg4[%c0_6, %c0_7] : memref<8x32xf32, #tpu.memory_space<vmem>>, vector<8x32xf32>
    %c0_8 = arith.constant 0 : index
    %c0_9 = arith.constant 0 : index
    %5 = vector.load %arg5[%c0_8, %c0_9] : memref<32x32xbf16, #tpu.memory_space<vmem>>, vector<32x32xbf16>
    %c0_10 = arith.constant 0 : index
    %c0_11 = arith.constant 0 : index
    %c0_12 = arith.constant 0 : index
    %6 = vector.load %arg10[%c0_10, %c0_11, %c0_12] : memref<2x1x32xf32, #tpu.memory_space<vmem>>, vector<1x1x32xf32>
    %7 = vector.shape_cast %6 : vector<1x1x32xf32> to vector<1x32xf32>
    %c0_13 = arith.constant 0 : index
    %c0_14 = arith.constant 0 : index
    %c0_15 = arith.constant 0 : index
    %8 = vector.load %arg11[%c0_13, %c0_14, %c0_15] : memref<2x1x32xf32, #tpu.memory_space<vmem>>, vector<1x1x32xf32>
    %9 = vector.shape_cast %8 : vector<1x1x32xf32> to vector<1x32xf32>
    %cst = arith.constant dense<0.000000e+00> : vector<8xf32>
    %10 = vector.multi_reduction <add>, %0, %cst [1] : vector<8x32xf32> to vector<8xf32>
    %11 = vector.shape_cast %10 : vector<8xf32> to vector<8x1xf32>
    %cst_16 = arith.constant 3.200000e+01 : f32
    %12 = vector.broadcast %cst_16 : f32 to vector<8x1xf32>
    %13 = arith.divf %11, %12 : vector<8x1xf32>
    %14 = vector.broadcast %13 : vector<8x1xf32> to vector<8x32xf32>
    %15 = arith.subf %0, %14 : vector<8x32xf32>
    %16 = arith.mulf %15, %15 : vector<8x32xf32>
    %cst_17 = arith.constant dense<0.000000e+00> : vector<8xf32>
    %17 = vector.multi_reduction <add>, %16, %cst_17 [1] : vector<8x32xf32> to vector<8xf32>
    %18 = vector.shape_cast %17 : vector<8xf32> to vector<8x1xf32>
    %cst_18 = arith.constant 3.200000e+01 : f32
    %19 = vector.broadcast %cst_18 : f32 to vector<8x1xf32>
    %20 = arith.divf %18, %19 : vector<8x1xf32>
    %cst_19 = arith.constant 9.99999974E-6 : f32
    %21 = vector.broadcast %cst_19 : f32 to vector<8x1xf32>
    %22 = arith.addf %20, %21 : vector<8x1xf32>
    %23 = math.rsqrt %22 : vector<8x1xf32>
    %24 = vector.broadcast %23 : vector<8x1xf32> to vector<8x32xf32>
    %25 = arith.mulf %15, %24 : vector<8x32xf32>
    %26 = vector.broadcast %7 : vector<1x32xf32> to vector<8x32xf32>
    %27 = arith.mulf %25, %26 : vector<8x32xf32>
    %28 = vector.broadcast %9 : vector<1x32xf32> to vector<8x32xf32>
    %29 = arith.addf %27, %28 : vector<8x32xf32>
    %c0_20 = arith.constant 0 : index
    %c0_21 = arith.constant 0 : index
    %c0_22 = arith.constant 0 : index
    %30 = vector.load %arg6[%c0_20, %c0_21, %c0_22] : memref<2x32x96xbf16, #tpu.memory_space<vmem>>, vector<1x32x96xbf16>
    %31 = vector.shape_cast %30 : vector<1x32x96xbf16> to vector<32x96xbf16>
    %32 = arith.truncf %29 : vector<8x32xf32> to vector<8x32xbf16>
    %cst_23 = arith.constant dense<0.000000e+00> : vector<8x96xf32>
    %33 = tpu.matmul %32, %31, %cst_23 {dimension_numbers = #tpu.dot_dimension_numbers<[1], [0], [0], [1], [0, 0, 1, 1], [], []>} : vector<8x32xbf16>, vector<32x96xbf16>, vector<8x96xf32> -> vector<8x96xf32>
    %c0_24 = arith.constant 0 : index
    %c0_25 = arith.constant 0 : index
    %c0_26 = arith.constant 0 : index
    %34 = vector.load %arg7[%c0_24, %c0_25, %c0_26] : memref<2x1x96xf32, #tpu.memory_space<vmem>>, vector<1x1x96xf32>
    %35 = vector.shape_cast %34 : vector<1x1x96xf32> to vector<1x96xf32>
    %36 = vector.broadcast %35 : vector<1x96xf32> to vector<8x96xf32>
    %37 = arith.addf %33, %36 : vector<8x96xf32>
    %38 = vector.extract_strided_slice %37 {offsets = [0, 0], sizes = [8, 32], strides = [1, 1]} : vector<8x96xf32> to vector<8x32xf32>
    %39 = vector.extract_strided_slice %37 {offsets = [0, 32], sizes = [8, 32], strides = [1, 1]} : vector<8x96xf32> to vector<8x32xf32>
    %40 = vector.extract_strided_slice %37 {offsets = [0, 64], sizes = [8, 32], strides = [1, 1]} : vector<8x96xf32> to vector<8x32xf32>
    %41 = arith.mulf %38, %3 : vector<8x32xf32>
    %42 = arith.truncf %38 : vector<8x32xf32> to vector<8x32xbf16>
    %cst_27 = arith.constant dense<0.000000e+00> : vector<8x32xf32>
    %43 = tpu.matmul %42, %5, %cst_27 {dimension_numbers = #tpu.dot_dimension_numbers<[1], [0], [0], [1], [0, 0, 1, 1], [], []>} : vector<8x32xbf16>, vector<32x32xbf16>, vector<8x32xf32> -> vector<8x32xf32>
    %44 = arith.mulf %43, %4 : vector<8x32xf32>
    %45 = arith.addf %41, %44 : vector<8x32xf32>
    %46 = arith.mulf %39, %3 : vector<8x32xf32>
    %47 = arith.truncf %39 : vector<8x32xf32> to vector<8x32xbf16>
    %cst_28 = arith.constant dense<0.000000e+00> : vector<8x32xf32>
    %48 = tpu.matmul %47, %5, %cst_28 {dimension_numbers = #tpu.dot_dimension_numbers<[1], [0], [0], [1], [0, 0, 1, 1], [], []>} : vector<8x32xbf16>, vector<32x32xbf16>, vector<8x32xf32> -> vector<8x32xf32>
    %49 = arith.mulf %48, %4 : vector<8x32xf32>
    %50 = arith.addf %46, %49 : vector<8x32xf32>
    %51 = vector.extract_strided_slice %45 {offsets = [0, 0], sizes = [8, 8], strides = [1, 1]} : vector<8x32xf32> to vector<8x8xf32>
    %52 = arith.truncf %51 : vector<8x8xf32> to vector<8x8xbf16>
    %53 = vector.extract_strided_slice %50 {offsets = [0, 0], sizes = [8, 8], strides = [1, 1]} : vector<8x32xf32> to vector<8x8xf32>
    %54 = arith.truncf %53 : vector<8x8xf32> to vector<8x8xbf16>
    %55 = vector.extract_strided_slice %40 {offsets = [0, 0], sizes = [8, 8], strides = [1, 1]} : vector<8x32xf32> to vector<8x8xf32>
    %56 = arith.truncf %55 : vector<8x8xf32> to vector<8x8xbf16>
    %cst_29 = arith.constant dense<0.000000e+00> : vector<8x8xf32>
    %57 = tpu.matmul %52, %54, %cst_29 {dimension_numbers = #tpu.dot_dimension_numbers<[1], [1], [0], [0], [0, 0, 1, 0], [], []>} : vector<8x8xbf16>, vector<8x8xbf16>, vector<8x8xf32> -> vector<8x8xf32>
    %cst_30 = arith.constant 5.000000e-01 : f32
    %58 = vector.broadcast %cst_30 : f32 to vector<1x8xf32>
    %59 = arith.cmpf ogt, %2, %58 : vector<1x8xf32>
    %cst_31 = arith.constant -1.000000e+30 : f32
    %60 = vector.shape_cast %59 : vector<1x8xi1> to vector<1x8xi1>
    %61 = vector.broadcast %60 : vector<1x8xi1> to vector<8x8xi1>
    %62 = vector.broadcast %cst_31 : f32 to vector<8x8xf32>
    %63 = arith.select %61, %62, %57 : vector<8x8xi1>, vector<8x8xf32>
    %cst_32 = arith.constant dense<0xFF800000> : vector<8xf32>
    %64 = vector.multi_reduction <maximumf>, %63, %cst_32 [1] : vector<8x8xf32> to vector<8xf32>
    %65 = vector.shape_cast %64 : vector<8xf32> to vector<8x1xf32>
    %66 = vector.broadcast %65 : vector<8x1xf32> to vector<8x8xf32>
    %67 = arith.subf %63, %66 : vector<8x8xf32>
    %68 = math.exp %67 : vector<8x8xf32>
    %cst_33 = arith.constant dense<0.000000e+00> : vector<8xf32>
    %69 = vector.multi_reduction <add>, %68, %cst_33 [1] : vector<8x8xf32> to vector<8xf32>
    %70 = vector.shape_cast %69 : vector<8xf32> to vector<8x1xf32>
    %71 = vector.broadcast %70 : vector<8x1xf32> to vector<8x8xf32>
    %72 = arith.divf %68, %71 : vector<8x8xf32>
    %73 = arith.truncf %72 : vector<8x8xf32> to vector<8x8xbf16>
    %cst_34 = arith.constant dense<0.000000e+00> : vector<8x8xf32>
    %74 = tpu.matmul %73, %56, %cst_34 {dimension_numbers = #tpu.dot_dimension_numbers<[1], [0], [0], [1], [0, 0, 1, 1], [], []>} : vector<8x8xbf16>, vector<8x8xbf16>, vector<8x8xf32> -> vector<8x8xf32>
    %75 = vector.extract_strided_slice %45 {offsets = [0, 8], sizes = [8, 8], strides = [1, 1]} : vector<8x32xf32> to vector<8x8xf32>
    %76 = arith.truncf %75 : vector<8x8xf32> to vector<8x8xbf16>
    %77 = vector.extract_strided_slice %50 {offsets = [0, 8], sizes = [8, 8], strides = [1, 1]} : vector<8x32xf32> to vector<8x8xf32>
    %78 = arith.truncf %77 : vector<8x8xf32> to vector<8x8xbf16>
    %79 = vector.extract_strided_slice %40 {offsets = [0, 8], sizes = [8, 8], strides = [1, 1]} : vector<8x32xf32> to vector<8x8xf32>
    %80 = arith.truncf %79 : vector<8x8xf32> to vector<8x8xbf16>
    %cst_35 = arith.constant dense<0.000000e+00> : vector<8x8xf32>
    %81 = tpu.matmul %76, %78, %cst_35 {dimension_numbers = #tpu.dot_dimension_numbers<[1], [1], [0], [0], [0, 0, 1, 0], [], []>} : vector<8x8xbf16>, vector<8x8xbf16>, vector<8x8xf32> -> vector<8x8xf32>
    %cst_36 = arith.constant 5.000000e-01 : f32
    %82 = vector.broadcast %cst_36 : f32 to vector<1x8xf32>
    %83 = arith.cmpf ogt, %2, %82 : vector<1x8xf32>
    %cst_37 = arith.constant -1.000000e+30 : f32
    %84 = vector.shape_cast %83 : vector<1x8xi1> to vector<1x8xi1>
    %85 = vector.broadcast %84 : vector<1x8xi1> to vector<8x8xi1>
    %86 = vector.broadcast %cst_37 : f32 to vector<8x8xf32>
    %87 = arith.select %85, %86, %81 : vector<8x8xi1>, vector<8x8xf32>
    %cst_38 = arith.constant dense<0xFF800000> : vector<8xf32>
    %88 = vector.multi_reduction <maximumf>, %87, %cst_38 [1] : vector<8x8xf32> to vector<8xf32>
    %89 = vector.shape_cast %88 : vector<8xf32> to vector<8x1xf32>
    %90 = vector.broadcast %89 : vector<8x1xf32> to vector<8x8xf32>
    %91 = arith.subf %87, %90 : vector<8x8xf32>
    %92 = math.exp %91 : vector<8x8xf32>
    %cst_39 = arith.constant dense<0.000000e+00> : vector<8xf32>
    %93 = vector.multi_reduction <add>, %92, %cst_39 [1] : vector<8x8xf32> to vector<8xf32>
    %94 = vector.shape_cast %93 : vector<8xf32> to vector<8x1xf32>
    %95 = vector.broadcast %94 : vector<8x1xf32> to vector<8x8xf32>
    %96 = arith.divf %92, %95 : vector<8x8xf32>
    %97 = arith.truncf %96 : vector<8x8xf32> to vector<8x8xbf16>
    %cst_40 = arith.constant dense<0.000000e+00> : vector<8x8xf32>
    %98 = tpu.matmul %97, %80, %cst_40 {dimension_numbers = #tpu.dot_dimension_numbers<[1], [0], [0], [1], [0, 0, 1, 1], [], []>} : vector<8x8xbf16>, vector<8x8xbf16>, vector<8x8xf32> -> vector<8x8xf32>
    %99 = vector.extract_strided_slice %45 {offsets = [0, 16], sizes = [8, 8], strides = [1, 1]} : vector<8x32xf32> to vector<8x8xf32>
    %100 = arith.truncf %99 : vector<8x8xf32> to vector<8x8xbf16>
    %101 = vector.extract_strided_slice %50 {offsets = [0, 16], sizes = [8, 8], strides = [1, 1]} : vector<8x32xf32> to vector<8x8xf32>
    %102 = arith.truncf %101 : vector<8x8xf32> to vector<8x8xbf16>
    %103 = vector.extract_strided_slice %40 {offsets = [0, 16], sizes = [8, 8], strides = [1, 1]} : vector<8x32xf32> to vector<8x8xf32>
    %104 = arith.truncf %103 : vector<8x8xf32> to vector<8x8xbf16>
    %cst_41 = arith.constant dense<0.000000e+00> : vector<8x8xf32>
    %105 = tpu.matmul %100, %102, %cst_41 {dimension_numbers = #tpu.dot_dimension_numbers<[1], [1], [0], [0], [0, 0, 1, 0], [], []>} : vector<8x8xbf16>, vector<8x8xbf16>, vector<8x8xf32> -> vector<8x8xf32>
    %cst_42 = arith.constant 5.000000e-01 : f32
    %106 = vector.broadcast %cst_42 : f32 to vector<1x8xf32>
    %107 = arith.cmpf ogt, %2, %106 : vector<1x8xf32>
    %cst_43 = arith.constant -1.000000e+30 : f32
    %108 = vector.shape_cast %107 : vector<1x8xi1> to vector<1x8xi1>
    %109 = vector.broadcast %108 : vector<1x8xi1> to vector<8x8xi1>
    %110 = vector.broadcast %cst_43 : f32 to vector<8x8xf32>
    %111 = arith.select %109, %110, %105 : vector<8x8xi1>, vector<8x8xf32>
    %cst_44 = arith.constant dense<0xFF800000> : vector<8xf32>
    %112 = vector.multi_reduction <maximumf>, %111, %cst_44 [1] : vector<8x8xf32> to vector<8xf32>
    %113 = vector.shape_cast %112 : vector<8xf32> to vector<8x1xf32>
    %114 = vector.broadcast %113 : vector<8x1xf32> to vector<8x8xf32>
    %115 = arith.subf %111, %114 : vector<8x8xf32>
    %116 = math.exp %115 : vector<8x8xf32>
    %cst_45 = arith.constant dense<0.000000e+00> : vector<8xf32>
    %117 = vector.multi_reduction <add>, %116, %cst_45 [1] : vector<8x8xf32> to vector<8xf32>
    %118 = vector.shape_cast %117 : vector<8xf32> to vector<8x1xf32>
    %119 = vector.broadcast %118 : vector<8x1xf32> to vector<8x8xf32>
    %120 = arith.divf %116, %119 : vector<8x8xf32>
    %121 = arith.truncf %120 : vector<8x8xf32> to vector<8x8xbf16>
    %cst_46 = arith.constant dense<0.000000e+00> : vector<8x8xf32>
    %122 = tpu.matmul %121, %104, %cst_46 {dimension_numbers = #tpu.dot_dimension_numbers<[1], [0], [0], [1], [0, 0, 1, 1], [], []>} : vector<8x8xbf16>, vector<8x8xbf16>, vector<8x8xf32> -> vector<8x8xf32>
    %123 = vector.extract_strided_slice %45 {offsets = [0, 24], sizes = [8, 8], strides = [1, 1]} : vector<8x32xf32> to vector<8x8xf32>
    %124 = arith.truncf %123 : vector<8x8xf32> to vector<8x8xbf16>
    %125 = vector.extract_strided_slice %50 {offsets = [0, 24], sizes = [8, 8], strides = [1, 1]} : vector<8x32xf32> to vector<8x8xf32>
    %126 = arith.truncf %125 : vector<8x8xf32> to vector<8x8xbf16>
    %127 = vector.extract_strided_slice %40 {offsets = [0, 24], sizes = [8, 8], strides = [1, 1]} : vector<8x32xf32> to vector<8x8xf32>
    %128 = arith.truncf %127 : vector<8x8xf32> to vector<8x8xbf16>
    %cst_47 = arith.constant dense<0.000000e+00> : vector<8x8xf32>
    %129 = tpu.matmul %124, %126, %cst_47 {dimension_numbers = #tpu.dot_dimension_numbers<[1], [1], [0], [0], [0, 0, 1, 0], [], []>} : vector<8x8xbf16>, vector<8x8xbf16>, vector<8x8xf32> -> vector<8x8xf32>
    %cst_48 = arith.constant 5.000000e-01 : f32
    %130 = vector.broadcast %cst_48 : f32 to vector<1x8xf32>
    %131 = arith.cmpf ogt, %2, %130 : vector<1x8xf32>
    %cst_49 = arith.constant -1.000000e+30 : f32
    %132 = vector.shape_cast %131 : vector<1x8xi1> to vector<1x8xi1>
    %133 = vector.broadcast %132 : vector<1x8xi1> to vector<8x8xi1>
    %134 = vector.broadcast %cst_49 : f32 to vector<8x8xf32>
    %135 = arith.select %133, %134, %129 : vector<8x8xi1>, vector<8x8xf32>
    %cst_50 = arith.constant dense<0xFF800000> : vector<8xf32>
    %136 = vector.multi_reduction <maximumf>, %135, %cst_50 [1] : vector<8x8xf32> to vector<8xf32>
    %137 = vector.shape_cast %136 : vector<8xf32> to vector<8x1xf32>
    %138 = vector.broadcast %137 : vector<8x1xf32> to vector<8x8xf32>
    %139 = arith.subf %135, %138 : vector<8x8xf32>
    %140 = math.exp %139 : vector<8x8xf32>
    %cst_51 = arith.constant dense<0.000000e+00> : vector<8xf32>
    %141 = vector.multi_reduction <add>, %140, %cst_51 [1] : vector<8x8xf32> to vector<8xf32>
    %142 = vector.shape_cast %141 : vector<8xf32> to vector<8x1xf32>
    %143 = vector.broadcast %142 : vector<8x1xf32> to vector<8x8xf32>
    %144 = arith.divf %140, %143 : vector<8x8xf32>
    %145 = arith.truncf %144 : vector<8x8xf32> to vector<8x8xbf16>
    %cst_52 = arith.constant dense<0.000000e+00> : vector<8x8xf32>
    %146 = tpu.matmul %145, %128, %cst_52 {dimension_numbers = #tpu.dot_dimension_numbers<[1], [0], [0], [1], [0, 0, 1, 1], [], []>} : vector<8x8xbf16>, vector<8x8xbf16>, vector<8x8xf32> -> vector<8x8xf32>
    %147 = tpu.concatenate %74, %98, %122, %146 in 1 : vector<8x8xf32>, vector<8x8xf32>, vector<8x8xf32>, vector<8x8xf32> -> vector<8x32xf32>
    %c0_53 = arith.constant 0 : index
    %c0_54 = arith.constant 0 : index
    %c0_55 = arith.constant 0 : index
    %148 = vector.load %arg8[%c0_53, %c0_54, %c0_55] : memref<2x32x32xbf16, #tpu.memory_space<vmem>>, vector<1x32x32xbf16>
    %149 = vector.shape_cast %148 : vector<1x32x32xbf16> to vector<32x32xbf16>
    %150 = arith.truncf %147 : vector<8x32xf32> to vector<8x32xbf16>
    %cst_56 = arith.constant dense<0.000000e+00> : vector<8x32xf32>
    %151 = tpu.matmul %150, %149, %cst_56 {dimension_numbers = #tpu.dot_dimension_numbers<[1], [0], [0], [1], [0, 0, 1, 1], [], []>} : vector<8x32xbf16>, vector<32x32xbf16>, vector<8x32xf32> -> vector<8x32xf32>
    %152 = arith.addf %0, %151 : vector<8x32xf32>
    %c0_57 = arith.constant 0 : index
    %c0_58 = arith.constant 0 : index
    %c0_59 = arith.constant 0 : index
    %153 = vector.load %arg9[%c0_57, %c0_58, %c0_59] : memref<2x1x32xf32, #tpu.memory_space<vmem>>, vector<1x1x32xf32>
    %154 = vector.shape_cast %153 : vector<1x1x32xf32> to vector<1x32xf32>
    %155 = vector.broadcast %154 : vector<1x32xf32> to vector<8x32xf32>
    %156 = arith.addf %152, %155 : vector<8x32xf32>
    %c0_60 = arith.constant 0 : index
    %c0_61 = arith.constant 0 : index
    %c0_62 = arith.constant 0 : index
    %157 = vector.load %arg12[%c0_60, %c0_61, %c0_62] : memref<2x1x32xf32, #tpu.memory_space<vmem>>, vector<1x1x32xf32>
    %158 = vector.shape_cast %157 : vector<1x1x32xf32> to vector<1x32xf32>
    %c0_63 = arith.constant 0 : index
    %c0_64 = arith.constant 0 : index
    %c0_65 = arith.constant 0 : index
    %159 = vector.load %arg13[%c0_63, %c0_64, %c0_65] : memref<2x1x32xf32, #tpu.memory_space<vmem>>, vector<1x1x32xf32>
    %160 = vector.shape_cast %159 : vector<1x1x32xf32> to vector<1x32xf32>
    %cst_66 = arith.constant dense<0.000000e+00> : vector<8xf32>
    %161 = vector.multi_reduction <add>, %156, %cst_66 [1] : vector<8x32xf32> to vector<8xf32>
    %162 = vector.shape_cast %161 : vector<8xf32> to vector<8x1xf32>
    %cst_67 = arith.constant 3.200000e+01 : f32
    %163 = vector.broadcast %cst_67 : f32 to vector<8x1xf32>
    %164 = arith.divf %162, %163 : vector<8x1xf32>
    %165 = vector.broadcast %164 : vector<8x1xf32> to vector<8x32xf32>
    %166 = arith.subf %156, %165 : vector<8x32xf32>
    %167 = arith.mulf %166, %166 : vector<8x32xf32>
    %cst_68 = arith.constant dense<0.000000e+00> : vector<8xf32>
    %168 = vector.multi_reduction <add>, %167, %cst_68 [1] : vector<8x32xf32> to vector<8xf32>
    %169 = vector.shape_cast %168 : vector<8xf32> to vector<8x1xf32>
    %cst_69 = arith.constant 3.200000e+01 : f32
    %170 = vector.broadcast %cst_69 : f32 to vector<8x1xf32>
    %171 = arith.divf %169, %170 : vector<8x1xf32>
    %cst_70 = arith.constant 9.99999974E-6 : f32
    %172 = vector.broadcast %cst_70 : f32 to vector<8x1xf32>
    %173 = arith.addf %171, %172 : vector<8x1xf32>
    %174 = math.rsqrt %173 : vector<8x1xf32>
    %175 = vector.broadcast %174 : vector<8x1xf32> to vector<8x32xf32>
    %176 = arith.mulf %166, %175 : vector<8x32xf32>
    %177 = vector.broadcast %158 : vector<1x32xf32> to vector<8x32xf32>
    %178 = arith.mulf %176, %177 : vector<8x32xf32>
    %179 = vector.broadcast %160 : vector<1x32xf32> to vector<8x32xf32>
    %180 = arith.addf %178, %179 : vector<8x32xf32>
    %c0_71 = arith.constant 0 : index
    %c0_72 = arith.constant 0 : index
    %c0_73 = arith.constant 0 : index
    %181 = vector.load %arg14[%c0_71, %c0_72, %c0_73] : memref<2x32x128xbf16, #tpu.memory_space<vmem>>, vector<1x32x128xbf16>
    %182 = vector.shape_cast %181 : vector<1x32x128xbf16> to vector<32x128xbf16>
    %183 = arith.truncf %180 : vector<8x32xf32> to vector<8x32xbf16>
    %cst_74 = arith.constant dense<0.000000e+00> : vector<8x128xf32>
    %184 = tpu.matmul %183, %182, %cst_74 {dimension_numbers = #tpu.dot_dimension_numbers<[1], [0], [0], [1], [0, 0, 1, 1], [], []>} : vector<8x32xbf16>, vector<32x128xbf16>, vector<8x128xf32> -> vector<8x128xf32>
    %c0_75 = arith.constant 0 : index
    %c0_76 = arith.constant 0 : index
    %c0_77 = arith.constant 0 : index
    %185 = vector.load %arg15[%c0_75, %c0_76, %c0_77] : memref<2x1x128xf32, #tpu.memory_space<vmem>>, vector<1x1x128xf32>
    %186 = vector.shape_cast %185 : vector<1x1x128xf32> to vector<1x128xf32>
    %187 = vector.broadcast %186 : vector<1x128xf32> to vector<8x128xf32>
    %188 = arith.addf %184, %187 : vector<8x128xf32>
    %cst_78 = arith.constant 5.000000e-01 : f32
    %189 = vector.broadcast %cst_78 : f32 to vector<8x128xf32>
    %190 = arith.mulf %189, %188 : vector<8x128xf32>
    %cst_79 = arith.constant 0.707106769 : f32
    %191 = vector.broadcast %cst_79 : f32 to vector<8x128xf32>
    %192 = arith.mulf %188, %191 : vector<8x128xf32>
    %cst_80 = arith.constant 0.000000e+00 : f32
    %193 = vector.broadcast %cst_80 : f32 to vector<8x128xf32>
    %194 = arith.cmpf oge, %192, %193 : vector<8x128xf32>
    %cst_81 = arith.constant 1.000000e+00 : f32
    %cst_82 = arith.constant -1.000000e+00 : f32
    %195 = vector.broadcast %cst_81 : f32 to vector<8x128xf32>
    %196 = vector.broadcast %cst_82 : f32 to vector<8x128xf32>
    %197 = arith.select %194, %195, %196 : vector<8x128xi1>, vector<8x128xf32>
    %198 = math.absf %192 : vector<8x128xf32>
    %cst_83 = arith.constant 0.327591091 : f32
    %199 = vector.broadcast %cst_83 : f32 to vector<8x128xf32>
    %200 = arith.mulf %199, %198 : vector<8x128xf32>
    %cst_84 = arith.constant 1.000000e+00 : f32
    %201 = vector.broadcast %cst_84 : f32 to vector<8x128xf32>
    %202 = arith.addf %201, %200 : vector<8x128xf32>
    %cst_85 = arith.constant 1.000000e+00 : f32
    %203 = vector.broadcast %cst_85 : f32 to vector<8x128xf32>
    %204 = arith.divf %203, %202 : vector<8x128xf32>
    %cst_86 = arith.constant 1.06140542 : f32
    %205 = vector.broadcast %cst_86 : f32 to vector<8x128xf32>
    %206 = arith.mulf %204, %205 : vector<8x128xf32>
    %cst_87 = arith.constant -1.45315206 : f32
    %207 = vector.broadcast %cst_87 : f32 to vector<8x128xf32>
    %208 = arith.addf %207, %206 : vector<8x128xf32>
    %209 = arith.mulf %204, %208 : vector<8x128xf32>
    %cst_88 = arith.constant 1.42141378 : f32
    %210 = vector.broadcast %cst_88 : f32 to vector<8x128xf32>
    %211 = arith.addf %210, %209 : vector<8x128xf32>
    %212 = arith.mulf %204, %211 : vector<8x128xf32>
    %cst_89 = arith.constant -0.284496725 : f32
    %213 = vector.broadcast %cst_89 : f32 to vector<8x128xf32>
    %214 = arith.addf %213, %212 : vector<8x128xf32>
    %215 = arith.mulf %204, %214 : vector<8x128xf32>
    %cst_90 = arith.constant 0.254829586 : f32
    %216 = vector.broadcast %cst_90 : f32 to vector<8x128xf32>
    %217 = arith.addf %216, %215 : vector<8x128xf32>
    %218 = arith.mulf %204, %217 : vector<8x128xf32>
    %cst_91 = arith.constant 0.000000e+00 : f32
    %219 = vector.broadcast %cst_91 : f32 to vector<8x128xf32>
    %220 = arith.subf %219, %198 : vector<8x128xf32>
    %221 = arith.mulf %220, %198 : vector<8x128xf32>
    %222 = math.exp %221 : vector<8x128xf32>
    %223 = arith.mulf %218, %222 : vector<8x128xf32>
    %cst_92 = arith.constant 1.000000e+00 : f32
    %224 = vector.broadcast %cst_92 : f32 to vector<8x128xf32>
    %225 = arith.subf %224, %223 : vector<8x128xf32>
    %226 = arith.mulf %197, %225 : vector<8x128xf32>
    %cst_93 = arith.constant 1.000000e+00 : f32
    %227 = vector.broadcast %cst_93 : f32 to vector<8x128xf32>
    %228 = arith.addf %227, %226 : vector<8x128xf32>
    %229 = arith.mulf %190, %228 : vector<8x128xf32>
    %c0_94 = arith.constant 0 : index
    %c0_95 = arith.constant 0 : index
    %c0_96 = arith.constant 0 : index
    %230 = vector.load %arg16[%c0_94, %c0_95, %c0_96] : memref<2x128x32xbf16, #tpu.memory_space<vmem>>, vector<1x128x32xbf16>
    %231 = vector.shape_cast %230 : vector<1x128x32xbf16> to vector<128x32xbf16>
    %232 = arith.truncf %229 : vector<8x128xf32> to vector<8x128xbf16>
    %cst_97 = arith.constant dense<0.000000e+00> : vector<8x32xf32>
    %233 = tpu.matmul %232, %231, %cst_97 {dimension_numbers = #tpu.dot_dimension_numbers<[1], [0], [0], [1], [0, 0, 1, 1], [], []>} : vector<8x128xbf16>, vector<128x32xbf16>, vector<8x32xf32> -> vector<8x32xf32>
    %234 = arith.addf %156, %233 : vector<8x32xf32>
    %c0_98 = arith.constant 0 : index
    %c0_99 = arith.constant 0 : index
    %c0_100 = arith.constant 0 : index
    %235 = vector.load %arg17[%c0_98, %c0_99, %c0_100] : memref<2x1x32xf32, #tpu.memory_space<vmem>>, vector<1x1x32xf32>
    %236 = vector.shape_cast %235 : vector<1x1x32xf32> to vector<1x32xf32>
    %237 = vector.broadcast %236 : vector<1x32xf32> to vector<8x32xf32>
    %238 = arith.addf %234, %237 : vector<8x32xf32>
    %c1 = arith.constant 1 : index
    %c0_101 = arith.constant 0 : index
    %c0_102 = arith.constant 0 : index
    %239 = vector.load %arg10[%c1, %c0_101, %c0_102] : memref<2x1x32xf32, #tpu.memory_space<vmem>>, vector<1x1x32xf32>
    %240 = vector.shape_cast %239 : vector<1x1x32xf32> to vector<1x32xf32>
    %c1_103 = arith.constant 1 : index
    %c0_104 = arith.constant 0 : index
    %c0_105 = arith.constant 0 : index
    %241 = vector.load %arg11[%c1_103, %c0_104, %c0_105] : memref<2x1x32xf32, #tpu.memory_space<vmem>>, vector<1x1x32xf32>
    %242 = vector.shape_cast %241 : vector<1x1x32xf32> to vector<1x32xf32>
    %cst_106 = arith.constant dense<0.000000e+00> : vector<8xf32>
    %243 = vector.multi_reduction <add>, %238, %cst_106 [1] : vector<8x32xf32> to vector<8xf32>
    %244 = vector.shape_cast %243 : vector<8xf32> to vector<8x1xf32>
    %cst_107 = arith.constant 3.200000e+01 : f32
    %245 = vector.broadcast %cst_107 : f32 to vector<8x1xf32>
    %246 = arith.divf %244, %245 : vector<8x1xf32>
    %247 = vector.broadcast %246 : vector<8x1xf32> to vector<8x32xf32>
    %248 = arith.subf %238, %247 : vector<8x32xf32>
    %249 = arith.mulf %248, %248 : vector<8x32xf32>
    %cst_108 = arith.constant dense<0.000000e+00> : vector<8xf32>
    %250 = vector.multi_reduction <add>, %249, %cst_108 [1] : vector<8x32xf32> to vector<8xf32>
    %251 = vector.shape_cast %250 : vector<8xf32> to vector<8x1xf32>
    %cst_109 = arith.constant 3.200000e+01 : f32
    %252 = vector.broadcast %cst_109 : f32 to vector<8x1xf32>
    %253 = arith.divf %251, %252 : vector<8x1xf32>
    %cst_110 = arith.constant 9.99999974E-6 : f32
    %254 = vector.broadcast %cst_110 : f32 to vector<8x1xf32>
    %255 = arith.addf %253, %254 : vector<8x1xf32>
    %256 = math.rsqrt %255 : vector<8x1xf32>
    %257 = vector.broadcast %256 : vector<8x1xf32> to vector<8x32xf32>
    %258 = arith.mulf %248, %257 : vector<8x32xf32>
    %259 = vector.broadcast %240 : vector<1x32xf32> to vector<8x32xf32>
    %260 = arith.mulf %258, %259 : vector<8x32xf32>
    %261 = vector.broadcast %242 : vector<1x32xf32> to vector<8x32xf32>
    %262 = arith.addf %260, %261 : vector<8x32xf32>
    %c1_111 = arith.constant 1 : index
    %c0_112 = arith.constant 0 : index
    %c0_113 = arith.constant 0 : index
    %263 = vector.load %arg6[%c1_111, %c0_112, %c0_113] : memref<2x32x96xbf16, #tpu.memory_space<vmem>>, vector<1x32x96xbf16>
    %264 = vector.shape_cast %263 : vector<1x32x96xbf16> to vector<32x96xbf16>
    %265 = arith.truncf %262 : vector<8x32xf32> to vector<8x32xbf16>
    %cst_114 = arith.constant dense<0.000000e+00> : vector<8x96xf32>
    %266 = tpu.matmul %265, %264, %cst_114 {dimension_numbers = #tpu.dot_dimension_numbers<[1], [0], [0], [1], [0, 0, 1, 1], [], []>} : vector<8x32xbf16>, vector<32x96xbf16>, vector<8x96xf32> -> vector<8x96xf32>
    %c1_115 = arith.constant 1 : index
    %c0_116 = arith.constant 0 : index
    %c0_117 = arith.constant 0 : index
    %267 = vector.load %arg7[%c1_115, %c0_116, %c0_117] : memref<2x1x96xf32, #tpu.memory_space<vmem>>, vector<1x1x96xf32>
    %268 = vector.shape_cast %267 : vector<1x1x96xf32> to vector<1x96xf32>
    %269 = vector.broadcast %268 : vector<1x96xf32> to vector<8x96xf32>
    %270 = arith.addf %266, %269 : vector<8x96xf32>
    %271 = vector.extract_strided_slice %270 {offsets = [0, 0], sizes = [8, 32], strides = [1, 1]} : vector<8x96xf32> to vector<8x32xf32>
    %272 = vector.extract_strided_slice %270 {offsets = [0, 32], sizes = [8, 32], strides = [1, 1]} : vector<8x96xf32> to vector<8x32xf32>
    %273 = vector.extract_strided_slice %270 {offsets = [0, 64], sizes = [8, 32], strides = [1, 1]} : vector<8x96xf32> to vector<8x32xf32>
    %274 = arith.mulf %271, %3 : vector<8x32xf32>
    %275 = arith.truncf %271 : vector<8x32xf32> to vector<8x32xbf16>
    %cst_118 = arith.constant dense<0.000000e+00> : vector<8x32xf32>
    %276 = tpu.matmul %275, %5, %cst_118 {dimension_numbers = #tpu.dot_dimension_numbers<[1], [0], [0], [1], [0, 0, 1, 1], [], []>} : vector<8x32xbf16>, vector<32x32xbf16>, vector<8x32xf32> -> vector<8x32xf32>
    %277 = arith.mulf %276, %4 : vector<8x32xf32>
    %278 = arith.addf %274, %277 : vector<8x32xf32>
    %279 = arith.mulf %272, %3 : vector<8x32xf32>
    %280 = arith.truncf %272 : vector<8x32xf32> to vector<8x32xbf16>
    %cst_119 = arith.constant dense<0.000000e+00> : vector<8x32xf32>
    %281 = tpu.matmul %280, %5, %cst_119 {dimension_numbers = #tpu.dot_dimension_numbers<[1], [0], [0], [1], [0, 0, 1, 1], [], []>} : vector<8x32xbf16>, vector<32x32xbf16>, vector<8x32xf32> -> vector<8x32xf32>
    %282 = arith.mulf %281, %4 : vector<8x32xf32>
    %283 = arith.addf %279, %282 : vector<8x32xf32>
    %284 = vector.extract_strided_slice %278 {offsets = [0, 0], sizes = [8, 8], strides = [1, 1]} : vector<8x32xf32> to vector<8x8xf32>
    %285 = arith.truncf %284 : vector<8x8xf32> to vector<8x8xbf16>
    %286 = vector.extract_strided_slice %283 {offsets = [0, 0], sizes = [8, 8], strides = [1, 1]} : vector<8x32xf32> to vector<8x8xf32>
    %287 = arith.truncf %286 : vector<8x8xf32> to vector<8x8xbf16>
    %288 = vector.extract_strided_slice %273 {offsets = [0, 0], sizes = [8, 8], strides = [1, 1]} : vector<8x32xf32> to vector<8x8xf32>
    %289 = arith.truncf %288 : vector<8x8xf32> to vector<8x8xbf16>
    %cst_120 = arith.constant dense<0.000000e+00> : vector<8x8xf32>
    %290 = tpu.matmul %285, %287, %cst_120 {dimension_numbers = #tpu.dot_dimension_numbers<[1], [1], [0], [0], [0, 0, 1, 0], [], []>} : vector<8x8xbf16>, vector<8x8xbf16>, vector<8x8xf32> -> vector<8x8xf32>
    %cst_121 = arith.constant 5.000000e-01 : f32
    %291 = vector.broadcast %cst_121 : f32 to vector<1x8xf32>
    %292 = arith.cmpf ogt, %2, %291 : vector<1x8xf32>
    %cst_122 = arith.constant -1.000000e+30 : f32
    %293 = vector.shape_cast %292 : vector<1x8xi1> to vector<1x8xi1>
    %294 = vector.broadcast %293 : vector<1x8xi1> to vector<8x8xi1>
    %295 = vector.broadcast %cst_122 : f32 to vector<8x8xf32>
    %296 = arith.select %294, %295, %290 : vector<8x8xi1>, vector<8x8xf32>
    %cst_123 = arith.constant dense<0xFF800000> : vector<8xf32>
    %297 = vector.multi_reduction <maximumf>, %296, %cst_123 [1] : vector<8x8xf32> to vector<8xf32>
    %298 = vector.shape_cast %297 : vector<8xf32> to vector<8x1xf32>
    %299 = vector.broadcast %298 : vector<8x1xf32> to vector<8x8xf32>
    %300 = arith.subf %296, %299 : vector<8x8xf32>
    %301 = math.exp %300 : vector<8x8xf32>
    %cst_124 = arith.constant dense<0.000000e+00> : vector<8xf32>
    %302 = vector.multi_reduction <add>, %301, %cst_124 [1] : vector<8x8xf32> to vector<8xf32>
    %303 = vector.shape_cast %302 : vector<8xf32> to vector<8x1xf32>
    %304 = vector.broadcast %303 : vector<8x1xf32> to vector<8x8xf32>
    %305 = arith.divf %301, %304 : vector<8x8xf32>
    %306 = arith.truncf %305 : vector<8x8xf32> to vector<8x8xbf16>
    %cst_125 = arith.constant dense<0.000000e+00> : vector<8x8xf32>
    %307 = tpu.matmul %306, %289, %cst_125 {dimension_numbers = #tpu.dot_dimension_numbers<[1], [0], [0], [1], [0, 0, 1, 1], [], []>} : vector<8x8xbf16>, vector<8x8xbf16>, vector<8x8xf32> -> vector<8x8xf32>
    %308 = vector.extract_strided_slice %278 {offsets = [0, 8], sizes = [8, 8], strides = [1, 1]} : vector<8x32xf32> to vector<8x8xf32>
    %309 = arith.truncf %308 : vector<8x8xf32> to vector<8x8xbf16>
    %310 = vector.extract_strided_slice %283 {offsets = [0, 8], sizes = [8, 8], strides = [1, 1]} : vector<8x32xf32> to vector<8x8xf32>
    %311 = arith.truncf %310 : vector<8x8xf32> to vector<8x8xbf16>
    %312 = vector.extract_strided_slice %273 {offsets = [0, 8], sizes = [8, 8], strides = [1, 1]} : vector<8x32xf32> to vector<8x8xf32>
    %313 = arith.truncf %312 : vector<8x8xf32> to vector<8x8xbf16>
    %cst_126 = arith.constant dense<0.000000e+00> : vector<8x8xf32>
    %314 = tpu.matmul %309, %311, %cst_126 {dimension_numbers = #tpu.dot_dimension_numbers<[1], [1], [0], [0], [0, 0, 1, 0], [], []>} : vector<8x8xbf16>, vector<8x8xbf16>, vector<8x8xf32> -> vector<8x8xf32>
    %cst_127 = arith.constant 5.000000e-01 : f32
    %315 = vector.broadcast %cst_127 : f32 to vector<1x8xf32>
    %316 = arith.cmpf ogt, %2, %315 : vector<1x8xf32>
    %cst_128 = arith.constant -1.000000e+30 : f32
    %317 = vector.shape_cast %316 : vector<1x8xi1> to vector<1x8xi1>
    %318 = vector.broadcast %317 : vector<1x8xi1> to vector<8x8xi1>
    %319 = vector.broadcast %cst_128 : f32 to vector<8x8xf32>
    %320 = arith.select %318, %319, %314 : vector<8x8xi1>, vector<8x8xf32>
    %cst_129 = arith.constant dense<0xFF800000> : vector<8xf32>
    %321 = vector.multi_reduction <maximumf>, %320, %cst_129 [1] : vector<8x8xf32> to vector<8xf32>
    %322 = vector.shape_cast %321 : vector<8xf32> to vector<8x1xf32>
    %323 = vector.broadcast %322 : vector<8x1xf32> to vector<8x8xf32>
    %324 = arith.subf %320, %323 : vector<8x8xf32>
    %325 = math.exp %324 : vector<8x8xf32>
    %cst_130 = arith.constant dense<0.000000e+00> : vector<8xf32>
    %326 = vector.multi_reduction <add>, %325, %cst_130 [1] : vector<8x8xf32> to vector<8xf32>
    %327 = vector.shape_cast %326 : vector<8xf32> to vector<8x1xf32>
    %328 = vector.broadcast %327 : vector<8x1xf32> to vector<8x8xf32>
    %329 = arith.divf %325, %328 : vector<8x8xf32>
    %330 = arith.truncf %329 : vector<8x8xf32> to vector<8x8xbf16>
    %cst_131 = arith.constant dense<0.000000e+00> : vector<8x8xf32>
    %331 = tpu.matmul %330, %313, %cst_131 {dimension_numbers = #tpu.dot_dimension_numbers<[1], [0], [0], [1], [0, 0, 1, 1], [], []>} : vector<8x8xbf16>, vector<8x8xbf16>, vector<8x8xf32> -> vector<8x8xf32>
    %332 = vector.extract_strided_slice %278 {offsets = [0, 16], sizes = [8, 8], strides = [1, 1]} : vector<8x32xf32> to vector<8x8xf32>
    %333 = arith.truncf %332 : vector<8x8xf32> to vector<8x8xbf16>
    %334 = vector.extract_strided_slice %283 {offsets = [0, 16], sizes = [8, 8], strides = [1, 1]} : vector<8x32xf32> to vector<8x8xf32>
    %335 = arith.truncf %334 : vector<8x8xf32> to vector<8x8xbf16>
    %336 = vector.extract_strided_slice %273 {offsets = [0, 16], sizes = [8, 8], strides = [1, 1]} : vector<8x32xf32> to vector<8x8xf32>
    %337 = arith.truncf %336 : vector<8x8xf32> to vector<8x8xbf16>
    %cst_132 = arith.constant dense<0.000000e+00> : vector<8x8xf32>
    %338 = tpu.matmul %333, %335, %cst_132 {dimension_numbers = #tpu.dot_dimension_numbers<[1], [1], [0], [0], [0, 0, 1, 0], [], []>} : vector<8x8xbf16>, vector<8x8xbf16>, vector<8x8xf32> -> vector<8x8xf32>
    %cst_133 = arith.constant 5.000000e-01 : f32
    %339 = vector.broadcast %cst_133 : f32 to vector<1x8xf32>
    %340 = arith.cmpf ogt, %2, %339 : vector<1x8xf32>
    %cst_134 = arith.constant -1.000000e+30 : f32
    %341 = vector.shape_cast %340 : vector<1x8xi1> to vector<1x8xi1>
    %342 = vector.broadcast %341 : vector<1x8xi1> to vector<8x8xi1>
    %343 = vector.broadcast %cst_134 : f32 to vector<8x8xf32>
    %344 = arith.select %342, %343, %338 : vector<8x8xi1>, vector<8x8xf32>
    %cst_135 = arith.constant dense<0xFF800000> : vector<8xf32>
    %345 = vector.multi_reduction <maximumf>, %344, %cst_135 [1] : vector<8x8xf32> to vector<8xf32>
    %346 = vector.shape_cast %345 : vector<8xf32> to vector<8x1xf32>
    %347 = vector.broadcast %346 : vector<8x1xf32> to vector<8x8xf32>
    %348 = arith.subf %344, %347 : vector<8x8xf32>
    %349 = math.exp %348 : vector<8x8xf32>
    %cst_136 = arith.constant dense<0.000000e+00> : vector<8xf32>
    %350 = vector.multi_reduction <add>, %349, %cst_136 [1] : vector<8x8xf32> to vector<8xf32>
    %351 = vector.shape_cast %350 : vector<8xf32> to vector<8x1xf32>
    %352 = vector.broadcast %351 : vector<8x1xf32> to vector<8x8xf32>
    %353 = arith.divf %349, %352 : vector<8x8xf32>
    %354 = arith.truncf %353 : vector<8x8xf32> to vector<8x8xbf16>
    %cst_137 = arith.constant dense<0.000000e+00> : vector<8x8xf32>
    %355 = tpu.matmul %354, %337, %cst_137 {dimension_numbers = #tpu.dot_dimension_numbers<[1], [0], [0], [1], [0, 0, 1, 1], [], []>} : vector<8x8xbf16>, vector<8x8xbf16>, vector<8x8xf32> -> vector<8x8xf32>
    %356 = vector.extract_strided_slice %278 {offsets = [0, 24], sizes = [8, 8], strides = [1, 1]} : vector<8x32xf32> to vector<8x8xf32>
    %357 = arith.truncf %356 : vector<8x8xf32> to vector<8x8xbf16>
    %358 = vector.extract_strided_slice %283 {offsets = [0, 24], sizes = [8, 8], strides = [1, 1]} : vector<8x32xf32> to vector<8x8xf32>
    %359 = arith.truncf %358 : vector<8x8xf32> to vector<8x8xbf16>
    %360 = vector.extract_strided_slice %273 {offsets = [0, 24], sizes = [8, 8], strides = [1, 1]} : vector<8x32xf32> to vector<8x8xf32>
    %361 = arith.truncf %360 : vector<8x8xf32> to vector<8x8xbf16>
    %cst_138 = arith.constant dense<0.000000e+00> : vector<8x8xf32>
    %362 = tpu.matmul %357, %359, %cst_138 {dimension_numbers = #tpu.dot_dimension_numbers<[1], [1], [0], [0], [0, 0, 1, 0], [], []>} : vector<8x8xbf16>, vector<8x8xbf16>, vector<8x8xf32> -> vector<8x8xf32>
    %cst_139 = arith.constant 5.000000e-01 : f32
    %363 = vector.broadcast %cst_139 : f32 to vector<1x8xf32>
    %364 = arith.cmpf ogt, %2, %363 : vector<1x8xf32>
    %cst_140 = arith.constant -1.000000e+30 : f32
    %365 = vector.shape_cast %364 : vector<1x8xi1> to vector<1x8xi1>
    %366 = vector.broadcast %365 : vector<1x8xi1> to vector<8x8xi1>
    %367 = vector.broadcast %cst_140 : f32 to vector<8x8xf32>
    %368 = arith.select %366, %367, %362 : vector<8x8xi1>, vector<8x8xf32>
    %cst_141 = arith.constant dense<0xFF800000> : vector<8xf32>
    %369 = vector.multi_reduction <maximumf>, %368, %cst_141 [1] : vector<8x8xf32> to vector<8xf32>
    %370 = vector.shape_cast %369 : vector<8xf32> to vector<8x1xf32>
    %371 = vector.broadcast %370 : vector<8x1xf32> to vector<8x8xf32>
    %372 = arith.subf %368, %371 : vector<8x8xf32>
    %373 = math.exp %372 : vector<8x8xf32>
    %cst_142 = arith.constant dense<0.000000e+00> : vector<8xf32>
    %374 = vector.multi_reduction <add>, %373, %cst_142 [1] : vector<8x8xf32> to vector<8xf32>
    %375 = vector.shape_cast %374 : vector<8xf32> to vector<8x1xf32>
    %376 = vector.broadcast %375 : vector<8x1xf32> to vector<8x8xf32>
    %377 = arith.divf %373, %376 : vector<8x8xf32>
    %378 = arith.truncf %377 : vector<8x8xf32> to vector<8x8xbf16>
    %cst_143 = arith.constant dense<0.000000e+00> : vector<8x8xf32>
    %379 = tpu.matmul %378, %361, %cst_143 {dimension_numbers = #tpu.dot_dimension_numbers<[1], [0], [0], [1], [0, 0, 1, 1], [], []>} : vector<8x8xbf16>, vector<8x8xbf16>, vector<8x8xf32> -> vector<8x8xf32>
    %380 = tpu.concatenate %307, %331, %355, %379 in 1 : vector<8x8xf32>, vector<8x8xf32>, vector<8x8xf32>, vector<8x8xf32> -> vector<8x32xf32>
    %c1_144 = arith.constant 1 : index
    %c0_145 = arith.constant 0 : index
    %c0_146 = arith.constant 0 : index
    %381 = vector.load %arg8[%c1_144, %c0_145, %c0_146] : memref<2x32x32xbf16, #tpu.memory_space<vmem>>, vector<1x32x32xbf16>
    %382 = vector.shape_cast %381 : vector<1x32x32xbf16> to vector<32x32xbf16>
    %383 = arith.truncf %380 : vector<8x32xf32> to vector<8x32xbf16>
    %cst_147 = arith.constant dense<0.000000e+00> : vector<8x32xf32>
    %384 = tpu.matmul %383, %382, %cst_147 {dimension_numbers = #tpu.dot_dimension_numbers<[1], [0], [0], [1], [0, 0, 1, 1], [], []>} : vector<8x32xbf16>, vector<32x32xbf16>, vector<8x32xf32> -> vector<8x32xf32>
    %385 = arith.addf %238, %384 : vector<8x32xf32>
    %c1_148 = arith.constant 1 : index
    %c0_149 = arith.constant 0 : index
    %c0_150 = arith.constant 0 : index
    %386 = vector.load %arg9[%c1_148, %c0_149, %c0_150] : memref<2x1x32xf32, #tpu.memory_space<vmem>>, vector<1x1x32xf32>
    %387 = vector.shape_cast %386 : vector<1x1x32xf32> to vector<1x32xf32>
    %388 = vector.broadcast %387 : vector<1x32xf32> to vector<8x32xf32>
    %389 = arith.addf %385, %388 : vector<8x32xf32>
    %c1_151 = arith.constant 1 : index
    %c0_152 = arith.constant 0 : index
    %c0_153 = arith.constant 0 : index
    %390 = vector.load %arg12[%c1_151, %c0_152, %c0_153] : memref<2x1x32xf32, #tpu.memory_space<vmem>>, vector<1x1x32xf32>
    %391 = vector.shape_cast %390 : vector<1x1x32xf32> to vector<1x32xf32>
    %c1_154 = arith.constant 1 : index
    %c0_155 = arith.constant 0 : index
    %c0_156 = arith.constant 0 : index
    %392 = vector.load %arg13[%c1_154, %c0_155, %c0_156] : memref<2x1x32xf32, #tpu.memory_space<vmem>>, vector<1x1x32xf32>
    %393 = vector.shape_cast %392 : vector<1x1x32xf32> to vector<1x32xf32>
    %cst_157 = arith.constant dense<0.000000e+00> : vector<8xf32>
    %394 = vector.multi_reduction <add>, %389, %cst_157 [1] : vector<8x32xf32> to vector<8xf32>
    %395 = vector.shape_cast %394 : vector<8xf32> to vector<8x1xf32>
    %cst_158 = arith.constant 3.200000e+01 : f32
    %396 = vector.broadcast %cst_158 : f32 to vector<8x1xf32>
    %397 = arith.divf %395, %396 : vector<8x1xf32>
    %398 = vector.broadcast %397 : vector<8x1xf32> to vector<8x32xf32>
    %399 = arith.subf %389, %398 : vector<8x32xf32>
    %400 = arith.mulf %399, %399 : vector<8x32xf32>
    %cst_159 = arith.constant dense<0.000000e+00> : vector<8xf32>
    %401 = vector.multi_reduction <add>, %400, %cst_159 [1] : vector<8x32xf32> to vector<8xf32>
    %402 = vector.shape_cast %401 : vector<8xf32> to vector<8x1xf32>
    %cst_160 = arith.constant 3.200000e+01 : f32
    %403 = vector.broadcast %cst_160 : f32 to vector<8x1xf32>
    %404 = arith.divf %402, %403 : vector<8x1xf32>
    %cst_161 = arith.constant 9.99999974E-6 : f32
    %405 = vector.broadcast %cst_161 : f32 to vector<8x1xf32>
    %406 = arith.addf %404, %405 : vector<8x1xf32>
    %407 = math.rsqrt %406 : vector<8x1xf32>
    %408 = vector.broadcast %407 : vector<8x1xf32> to vector<8x32xf32>
    %409 = arith.mulf %399, %408 : vector<8x32xf32>
    %410 = vector.broadcast %391 : vector<1x32xf32> to vector<8x32xf32>
    %411 = arith.mulf %409, %410 : vector<8x32xf32>
    %412 = vector.broadcast %393 : vector<1x32xf32> to vector<8x32xf32>
    %413 = arith.addf %411, %412 : vector<8x32xf32>
    %c1_162 = arith.constant 1 : index
    %c0_163 = arith.constant 0 : index
    %c0_164 = arith.constant 0 : index
    %414 = vector.load %arg14[%c1_162, %c0_163, %c0_164] : memref<2x32x128xbf16, #tpu.memory_space<vmem>>, vector<1x32x128xbf16>
    %415 = vector.shape_cast %414 : vector<1x32x128xbf16> to vector<32x128xbf16>
    %416 = arith.truncf %413 : vector<8x32xf32> to vector<8x32xbf16>
    %cst_165 = arith.constant dense<0.000000e+00> : vector<8x128xf32>
    %417 = tpu.matmul %416, %415, %cst_165 {dimension_numbers = #tpu.dot_dimension_numbers<[1], [0], [0], [1], [0, 0, 1, 1], [], []>} : vector<8x32xbf16>, vector<32x128xbf16>, vector<8x128xf32> -> vector<8x128xf32>
    %c1_166 = arith.constant 1 : index
    %c0_167 = arith.constant 0 : index
    %c0_168 = arith.constant 0 : index
    %418 = vector.load %arg15[%c1_166, %c0_167, %c0_168] : memref<2x1x128xf32, #tpu.memory_space<vmem>>, vector<1x1x128xf32>
    %419 = vector.shape_cast %418 : vector<1x1x128xf32> to vector<1x128xf32>
    %420 = vector.broadcast %419 : vector<1x128xf32> to vector<8x128xf32>
    %421 = arith.addf %417, %420 : vector<8x128xf32>
    %cst_169 = arith.constant 5.000000e-01 : f32
    %422 = vector.broadcast %cst_169 : f32 to vector<8x128xf32>
    %423 = arith.mulf %422, %421 : vector<8x128xf32>
    %cst_170 = arith.constant 0.707106769 : f32
    %424 = vector.broadcast %cst_170 : f32 to vector<8x128xf32>
    %425 = arith.mulf %421, %424 : vector<8x128xf32>
    %cst_171 = arith.constant 0.000000e+00 : f32
    %426 = vector.broadcast %cst_171 : f32 to vector<8x128xf32>
    %427 = arith.cmpf oge, %425, %426 : vector<8x128xf32>
    %cst_172 = arith.constant 1.000000e+00 : f32
    %cst_173 = arith.constant -1.000000e+00 : f32
    %428 = vector.broadcast %cst_172 : f32 to vector<8x128xf32>
    %429 = vector.broadcast %cst_173 : f32 to vector<8x128xf32>
    %430 = arith.select %427, %428, %429 : vector<8x128xi1>, vector<8x128xf32>
    %431 = math.absf %425 : vector<8x128xf32>
    %cst_174 = arith.constant 0.327591091 : f32
    %432 = vector.broadcast %cst_174 : f32 to vector<8x128xf32>
    %433 = arith.mulf %432, %431 : vector<8x128xf32>
    %cst_175 = arith.constant 1.000000e+00 : f32
    %434 = vector.broadcast %cst_175 : f32 to vector<8x128xf32>
    %435 = arith.addf %434, %433 : vector<8x128xf32>
    %cst_176 = arith.constant 1.000000e+00 : f32
    %436 = vector.broadcast %cst_176 : f32 to vector<8x128xf32>
    %437 = arith.divf %436, %435 : vector<8x128xf32>
    %cst_177 = arith.constant 1.06140542 : f32
    %438 = vector.broadcast %cst_177 : f32 to vector<8x128xf32>
    %439 = arith.mulf %437, %438 : vector<8x128xf32>
    %cst_178 = arith.constant -1.45315206 : f32
    %440 = vector.broadcast %cst_178 : f32 to vector<8x128xf32>
    %441 = arith.addf %440, %439 : vector<8x128xf32>
    %442 = arith.mulf %437, %441 : vector<8x128xf32>
    %cst_179 = arith.constant 1.42141378 : f32
    %443 = vector.broadcast %cst_179 : f32 to vector<8x128xf32>
    %444 = arith.addf %443, %442 : vector<8x128xf32>
    %445 = arith.mulf %437, %444 : vector<8x128xf32>
    %cst_180 = arith.constant -0.284496725 : f32
    %446 = vector.broadcast %cst_180 : f32 to vector<8x128xf32>
    %447 = arith.addf %446, %445 : vector<8x128xf32>
    %448 = arith.mulf %437, %447 : vector<8x128xf32>
    %cst_181 = arith.constant 0.254829586 : f32
    %449 = vector.broadcast %cst_181 : f32 to vector<8x128xf32>
    %450 = arith.addf %449, %448 : vector<8x128xf32>
    %451 = arith.mulf %437, %450 : vector<8x128xf32>
    %cst_182 = arith.constant 0.000000e+00 : f32
    %452 = vector.broadcast %cst_182 : f32 to vector<8x128xf32>
    %453 = arith.subf %452, %431 : vector<8x128xf32>
    %454 = arith.mulf %453, %431 : vector<8x128xf32>
    %455 = math.exp %454 : vector<8x128xf32>
    %456 = arith.mulf %451, %455 : vector<8x128xf32>
    %cst_183 = arith.constant 1.000000e+00 : f32
    %457 = vector.broadcast %cst_183 : f32 to vector<8x128xf32>
    %458 = arith.subf %457, %456 : vector<8x128xf32>
    %459 = arith.mulf %430, %458 : vector<8x128xf32>
    %cst_184 = arith.constant 1.000000e+00 : f32
    %460 = vector.broadcast %cst_184 : f32 to vector<8x128xf32>
    %461 = arith.addf %460, %459 : vector<8x128xf32>
    %462 = arith.mulf %423, %461 : vector<8x128xf32>
    %c1_185 = arith.constant 1 : index
    %c0_186 = arith.constant 0 : index
    %c0_187 = arith.constant 0 : index
    %463 = vector.load %arg16[%c1_185, %c0_186, %c0_187] : memref<2x128x32xbf16, #tpu.memory_space<vmem>>, vector<1x128x32xbf16>
    %464 = vector.shape_cast %463 : vector<1x128x32xbf16> to vector<128x32xbf16>
    %465 = arith.truncf %462 : vector<8x128xf32> to vector<8x128xbf16>
    %cst_188 = arith.constant dense<0.000000e+00> : vector<8x32xf32>
    %466 = tpu.matmul %465, %464, %cst_188 {dimension_numbers = #tpu.dot_dimension_numbers<[1], [0], [0], [1], [0, 0, 1, 1], [], []>} : vector<8x128xbf16>, vector<128x32xbf16>, vector<8x32xf32> -> vector<8x32xf32>
    %467 = arith.addf %389, %466 : vector<8x32xf32>
    %c1_189 = arith.constant 1 : index
    %c0_190 = arith.constant 0 : index
    %c0_191 = arith.constant 0 : index
    %468 = vector.load %arg17[%c1_189, %c0_190, %c0_191] : memref<2x1x32xf32, #tpu.memory_space<vmem>>, vector<1x1x32xf32>
    %469 = vector.shape_cast %468 : vector<1x1x32xf32> to vector<1x32xf32>
    %470 = vector.broadcast %469 : vector<1x32xf32> to vector<8x32xf32>
    %471 = arith.addf %467, %470 : vector<8x32xf32>
    %c0_192 = arith.constant 0 : index
    %c0_193 = arith.constant 0 : index
    %472 = vector.load %arg18[%c0_192, %c0_193] : memref<1x32xf32, #tpu.memory_space<vmem>>, vector<1x32xf32>
    %c0_194 = arith.constant 0 : index
    %c0_195 = arith.constant 0 : index
    %473 = vector.load %arg19[%c0_194, %c0_195] : memref<1x32xf32, #tpu.memory_space<vmem>>, vector<1x32xf32>
    %cst_196 = arith.constant dense<0.000000e+00> : vector<8xf32>
    %474 = vector.multi_reduction <add>, %471, %cst_196 [1] : vector<8x32xf32> to vector<8xf32>
    %475 = vector.shape_cast %474 : vector<8xf32> to vector<8x1xf32>
    %cst_197 = arith.constant 3.200000e+01 : f32
    %476 = vector.broadcast %cst_197 : f32 to vector<8x1xf32>
    %477 = arith.divf %475, %476 : vector<8x1xf32>
    %478 = vector.broadcast %477 : vector<8x1xf32> to vector<8x32xf32>
    %479 = arith.subf %471, %478 : vector<8x32xf32>
    %480 = arith.mulf %479, %479 : vector<8x32xf32>
    %cst_198 = arith.constant dense<0.000000e+00> : vector<8xf32>
    %481 = vector.multi_reduction <add>, %480, %cst_198 [1] : vector<8x32xf32> to vector<8xf32>
    %482 = vector.shape_cast %481 : vector<8xf32> to vector<8x1xf32>
    %cst_199 = arith.constant 3.200000e+01 : f32
    %483 = vector.broadcast %cst_199 : f32 to vector<8x1xf32>
    %484 = arith.divf %482, %483 : vector<8x1xf32>
    %cst_200 = arith.constant 9.99999974E-6 : f32
    %485 = vector.broadcast %cst_200 : f32 to vector<8x1xf32>
    %486 = arith.addf %484, %485 : vector<8x1xf32>
    %487 = math.rsqrt %486 : vector<8x1xf32>
    %488 = vector.broadcast %487 : vector<8x1xf32> to vector<8x32xf32>
    %489 = arith.mulf %479, %488 : vector<8x32xf32>
    %490 = vector.broadcast %472 : vector<1x32xf32> to vector<8x32xf32>
    %491 = arith.mulf %489, %490 : vector<8x32xf32>
    %492 = vector.broadcast %473 : vector<1x32xf32> to vector<8x32xf32>
    %493 = arith.addf %491, %492 : vector<8x32xf32>
    %c0_201 = arith.constant 0 : index
    %c0_202 = arith.constant 0 : index
    %494 = vector.load %arg20[%c0_201, %c0_202] : memref<32x32xbf16, #tpu.memory_space<vmem>>, vector<32x32xbf16>
    %495 = arith.truncf %493 : vector<8x32xf32> to vector<8x32xbf16>
    %cst_203 = arith.constant dense<0.000000e+00> : vector<8x32xf32>
    %496 = tpu.matmul %495, %494, %cst_203 {dimension_numbers = #tpu.dot_dimension_numbers<[1], [0], [0], [1], [0, 0, 1, 1], [], []>} : vector<8x32xbf16>, vector<32x32xbf16>, vector<8x32xf32> -> vector<8x32xf32>
    %c0_204 = arith.constant 0 : index
    %c0_205 = arith.constant 0 : index
    %497 = vector.load %arg21[%c0_204, %c0_205] : memref<1x32xf32, #tpu.memory_space<vmem>>, vector<1x32xf32>
    %498 = vector.broadcast %497 : vector<1x32xf32> to vector<8x32xf32>
    %499 = arith.addf %496, %498 : vector<8x32xf32>
    %cst_206 = arith.constant 5.000000e-01 : f32
    %500 = vector.broadcast %cst_206 : f32 to vector<8x32xf32>
    %501 = arith.mulf %500, %499 : vector<8x32xf32>
    %cst_207 = arith.constant 0.707106769 : f32
    %502 = vector.broadcast %cst_207 : f32 to vector<8x32xf32>
    %503 = arith.mulf %499, %502 : vector<8x32xf32>
    %cst_208 = arith.constant 0.000000e+00 : f32
    %504 = vector.broadcast %cst_208 : f32 to vector<8x32xf32>
    %505 = arith.cmpf oge, %503, %504 : vector<8x32xf32>
    %cst_209 = arith.constant 1.000000e+00 : f32
    %cst_210 = arith.constant -1.000000e+00 : f32
    %506 = vector.broadcast %cst_209 : f32 to vector<8x32xf32>
    %507 = vector.broadcast %cst_210 : f32 to vector<8x32xf32>
    %508 = arith.select %505, %506, %507 : vector<8x32xi1>, vector<8x32xf32>
    %509 = math.absf %503 : vector<8x32xf32>
    %cst_211 = arith.constant 0.327591091 : f32
    %510 = vector.broadcast %cst_211 : f32 to vector<8x32xf32>
    %511 = arith.mulf %510, %509 : vector<8x32xf32>
    %cst_212 = arith.constant 1.000000e+00 : f32
    %512 = vector.broadcast %cst_212 : f32 to vector<8x32xf32>
    %513 = arith.addf %512, %511 : vector<8x32xf32>
    %cst_213 = arith.constant 1.000000e+00 : f32
    %514 = vector.broadcast %cst_213 : f32 to vector<8x32xf32>
    %515 = arith.divf %514, %513 : vector<8x32xf32>
    %cst_214 = arith.constant 1.06140542 : f32
    %516 = vector.broadcast %cst_214 : f32 to vector<8x32xf32>
    %517 = arith.mulf %515, %516 : vector<8x32xf32>
    %cst_215 = arith.constant -1.45315206 : f32
    %518 = vector.broadcast %cst_215 : f32 to vector<8x32xf32>
    %519 = arith.addf %518, %517 : vector<8x32xf32>
    %520 = arith.mulf %515, %519 : vector<8x32xf32>
    %cst_216 = arith.constant 1.42141378 : f32
    %521 = vector.broadcast %cst_216 : f32 to vector<8x32xf32>
    %522 = arith.addf %521, %520 : vector<8x32xf32>
    %523 = arith.mulf %515, %522 : vector<8x32xf32>
    %cst_217 = arith.constant -0.284496725 : f32
    %524 = vector.broadcast %cst_217 : f32 to vector<8x32xf32>
    %525 = arith.addf %524, %523 : vector<8x32xf32>
    %526 = arith.mulf %515, %525 : vector<8x32xf32>
    %cst_218 = arith.constant 0.254829586 : f32
    %527 = vector.broadcast %cst_218 : f32 to vector<8x32xf32>
    %528 = arith.addf %527, %526 : vector<8x32xf32>
    %529 = arith.mulf %515, %528 : vector<8x32xf32>
    %cst_219 = arith.constant 0.000000e+00 : f32
    %530 = vector.broadcast %cst_219 : f32 to vector<8x32xf32>
    %531 = arith.subf %530, %509 : vector<8x32xf32>
    %532 = arith.mulf %531, %509 : vector<8x32xf32>
    %533 = math.exp %532 : vector<8x32xf32>
    %534 = arith.mulf %529, %533 : vector<8x32xf32>
    %cst_220 = arith.constant 1.000000e+00 : f32
    %535 = vector.broadcast %cst_220 : f32 to vector<8x32xf32>
    %536 = arith.subf %535, %534 : vector<8x32xf32>
    %537 = arith.mulf %508, %536 : vector<8x32xf32>
    %cst_221 = arith.constant 1.000000e+00 : f32
    %538 = vector.broadcast %cst_221 : f32 to vector<8x32xf32>
    %539 = arith.addf %538, %537 : vector<8x32xf32>
    %540 = arith.mulf %501, %539 : vector<8x32xf32>
    %c0_222 = arith.constant 0 : index
    %c0_223 = arith.constant 0 : index
    %541 = vector.load %arg22[%c0_222, %c0_223] : memref<1x32xf32, #tpu.memory_space<vmem>>, vector<1x32xf32>
    %c0_224 = arith.constant 0 : index
    %c0_225 = arith.constant 0 : index
    %542 = vector.load %arg23[%c0_224, %c0_225] : memref<1x32xf32, #tpu.memory_space<vmem>>, vector<1x32xf32>
    %cst_226 = arith.constant dense<0.000000e+00> : vector<8xf32>
    %543 = vector.multi_reduction <add>, %540, %cst_226 [1] : vector<8x32xf32> to vector<8xf32>
    %544 = vector.shape_cast %543 : vector<8xf32> to vector<8x1xf32>
    %cst_227 = arith.constant 3.200000e+01 : f32
    %545 = vector.broadcast %cst_227 : f32 to vector<8x1xf32>
    %546 = arith.divf %544, %545 : vector<8x1xf32>
    %547 = vector.broadcast %546 : vector<8x1xf32> to vector<8x32xf32>
    %548 = arith.subf %540, %547 : vector<8x32xf32>
    %549 = arith.mulf %548, %548 : vector<8x32xf32>
    %cst_228 = arith.constant dense<0.000000e+00> : vector<8xf32>
    %550 = vector.multi_reduction <add>, %549, %cst_228 [1] : vector<8x32xf32> to vector<8xf32>
    %551 = vector.shape_cast %550 : vector<8xf32> to vector<8x1xf32>
    %cst_229 = arith.constant 3.200000e+01 : f32
    %552 = vector.broadcast %cst_229 : f32 to vector<8x1xf32>
    %553 = arith.divf %551, %552 : vector<8x1xf32>
    %cst_230 = arith.constant 9.99999974E-6 : f32
    %554 = vector.broadcast %cst_230 : f32 to vector<8x1xf32>
    %555 = arith.addf %553, %554 : vector<8x1xf32>
    %556 = math.rsqrt %555 : vector<8x1xf32>
    %557 = vector.broadcast %556 : vector<8x1xf32> to vector<8x32xf32>
    %558 = arith.mulf %548, %557 : vector<8x32xf32>
    %559 = vector.broadcast %541 : vector<1x32xf32> to vector<8x32xf32>
    %560 = arith.mulf %558, %559 : vector<8x32xf32>
    %561 = vector.broadcast %542 : vector<1x32xf32> to vector<8x32xf32>
    %562 = arith.addf %560, %561 : vector<8x32xf32>
    %c0_231 = arith.constant 0 : index
    %c0_232 = arith.constant 0 : index
    %563 = vector.load %arg24[%c0_231, %c0_232] : memref<32x128xbf16, #tpu.memory_space<vmem>>, vector<32x128xbf16>
    %564 = arith.truncf %562 : vector<8x32xf32> to vector<8x32xbf16>
    %cst_233 = arith.constant dense<0.000000e+00> : vector<8x128xf32>
    %565 = tpu.matmul %564, %563, %cst_233 {dimension_numbers = #tpu.dot_dimension_numbers<[1], [0], [0], [1], [0, 0, 1, 1], [], []>} : vector<8x32xbf16>, vector<32x128xbf16>, vector<8x128xf32> -> vector<8x128xf32>
    %c0_234 = arith.constant 0 : index
    %c0_235 = arith.constant 0 : index
    %566 = vector.load %arg25[%c0_234, %c0_235] : memref<1x128xf32, #tpu.memory_space<vmem>>, vector<1x128xf32>
    %567 = vector.broadcast %566 : vector<1x128xf32> to vector<8x128xf32>
    %568 = arith.addf %565, %567 : vector<8x128xf32>
    %c0_236 = arith.constant 0 : index
    %c0_237 = arith.constant 0 : index
    %569 = vector.load %arg26[%c0_236, %c0_237] : memref<8x128xf32, #tpu.memory_space<vmem>>, vector<8x128xf32>
    tpu.vector_store %arg26[%c0_236, %c0_237], %568 {strides = array<i32>} : memref<8x128xf32, #tpu.memory_space<vmem>>, vector<8x128xf32>,
    return
  }
  func.func @transform_0(%arg0: i32) -> (i32, i32) {
    %c0_i32 = arith.constant 0 : i32
    %c0_i32_0 = arith.constant 0 : i32
    return %arg0, %c0_i32 : i32, i32
  }
  func.func @transform_1(%arg0: i32) -> (i32, i32, i32) {
    %c0_i32 = arith.constant 0 : i32
    %c0_i32_0 = arith.constant 0 : i32
    %c0_i32_1 = arith.constant 0 : i32
    return %arg0, %c0_i32, %c0_i32_0 : i32, i32, i32
  }
  func.func @transform_2(%arg0: i32) -> (i32, i32) {
    %c0_i32 = arith.constant 0 : i32
    %c0_i32_0 = arith.constant 0 : i32
    %c0_i32_1 = arith.constant 0 : i32
    return %c0_i32, %c0_i32_0 : i32, i32
  }
  func.func @transform_3(%arg0: i32) -> (i32, i32) {
    %c0_i32 = arith.constant 0 : i32
    %c0_i32_0 = arith.constant 0 : i32
    %c0_i32_1 = arith.constant 0 : i32
    return %c0_i32, %c0_i32_0 : i32, i32
  }
  func.func @transform_4(%arg0: i32) -> (i32, i32) {
    %c0_i32 = arith.constant 0 : i32
    %c0_i32_0 = arith.constant 0 : i32
    %c0_i32_1 = arith.constant 0 : i32
    return %c0_i32, %c0_i32_0 : i32, i32
  }
  func.func @transform_5(%arg0: i32) -> (i32, i32, i32) {
    %c0_i32 = arith.constant 0 : i32
    %c0_i32_0 = arith.constant 0 : i32
    %c0_i32_1 = arith.constant 0 : i32
    %c0_i32_2 = arith.constant 0 : i32
    return %c0_i32, %c0_i32_0, %c0_i32_1 : i32, i32, i32
  }
  func.func @transform_6(%arg0: i32) -> (i32, i32, i32) {
    %c0_i32 = arith.constant 0 : i32
    %c0_i32_0 = arith.constant 0 : i32
    %c0_i32_1 = arith.constant 0 : i32
    %c0_i32_2 = arith.constant 0 : i32
    return %c0_i32, %c0_i32_0, %c0_i32_1 : i32, i32, i32
  }
  func.func @transform_7(%arg0: i32) -> (i32, i32, i32) {
    %c0_i32 = arith.constant 0 : i32
    %c0_i32_0 = arith.constant 0 : i32
    %c0_i32_1 = arith.constant 0 : i32
    %c0_i32_2 = arith.constant 0 : i32
    return %c0_i32, %c0_i32_0, %c0_i32_1 : i32, i32, i32
  }
  func.func @transform_8(%arg0: i32) -> (i32, i32, i32) {
    %c0_i32 = arith.constant 0 : i32
    %c0_i32_0 = arith.constant 0 : i32
    %c0_i32_1 = arith.constant 0 : i32
    %c0_i32_2 = arith.constant 0 : i32
    return %c0_i32, %c0_i32_0, %c0_i32_1 : i32, i32, i32
  }
  func.func @transform_9(%arg0: i32) -> (i32, i32, i32) {
    %c0_i32 = arith.constant 0 : i32
    %c0_i32_0 = arith.constant 0 : i32
    %c0_i32_1 = arith.constant 0 : i32
    %c0_i32_2 = arith.constant 0 : i32
    return %c0_i32, %c0_i32_0, %c0_i32_1 : i32, i32, i32
  }
  func.func @transform_10(%arg0: i32) -> (i32, i32, i32) {
    %c0_i32 = arith.constant 0 : i32
    %c0_i32_0 = arith.constant 0 : i32
    %c0_i32_1 = arith.constant 0 : i32
    %c0_i32_2 = arith.constant 0 : i32
    return %c0_i32, %c0_i32_0, %c0_i32_1 : i32, i32, i32
  }
  func.func @transform_11(%arg0: i32) -> (i32, i32, i32) {
    %c0_i32 = arith.constant 0 : i32
    %c0_i32_0 = arith.constant 0 : i32
    %c0_i32_1 = arith.constant 0 : i32
    %c0_i32_2 = arith.constant 0 : i32
    return %c0_i32, %c0_i32_0, %c0_i32_1 : i32, i32, i32
  }
  func.func @transform_12(%arg0: i32) -> (i32, i32, i32) {
    %c0_i32 = arith.constant 0 : i32
    %c0_i32_0 = arith.constant 0 : i32
    %c0_i32_1 = arith.constant 0 : i32
    %c0_i32_2 = arith.constant 0 : i32
    return %c0_i32, %c0_i32_0, %c0_i32_1 : i32, i32, i32
  }
  func.func @transform_13(%arg0: i32) -> (i32, i32, i32) {
    %c0_i32 = arith.constant 0 : i32
    %c0_i32_0 = arith.constant 0 : i32
    %c0_i32_1 = arith.constant 0 : i32
    %c0_i32_2 = arith.constant 0 : i32
    return %c0_i32, %c0_i32_0, %c0_i32_1 : i32, i32, i32
  }
  func.func @transform_14(%arg0: i32) -> (i32, i32, i32) {
    %c0_i32 = arith.constant 0 : i32
    %c0_i32_0 = arith.constant 0 : i32
    %c0_i32_1 = arith.constant 0 : i32
    %c0_i32_2 = arith.constant 0 : i32
    return %c0_i32, %c0_i32_0, %c0_i32_1 : i32, i32, i32
  }
  func.func @transform_15(%arg0: i32) -> (i32, i32, i32) {
    %c0_i32 = arith.constant 0 : i32
    %c0_i32_0 = arith.constant 0 : i32
    %c0_i32_1 = arith.constant 0 : i32
    %c0_i32_2 = arith.constant 0 : i32
    return %c0_i32, %c0_i32_0, %c0_i32_1 : i32, i32, i32
  }
  func.func @transform_16(%arg0: i32) -> (i32, i32, i32) {
    %c0_i32 = arith.constant 0 : i32
    %c0_i32_0 = arith.constant 0 : i32
    %c0_i32_1 = arith.constant 0 : i32
    %c0_i32_2 = arith.constant 0 : i32
    return %c0_i32, %c0_i32_0, %c0_i32_1 : i32, i32, i32
  }
  func.func @transform_17(%arg0: i32) -> (i32, i32) {
    %c0_i32 = arith.constant 0 : i32
    %c0_i32_0 = arith.constant 0 : i32
    %c0_i32_1 = arith.constant 0 : i32
    return %c0_i32, %c0_i32_0 : i32, i32
  }
  func.func @transform_18(%arg0: i32) -> (i32, i32) {
    %c0_i32 = arith.constant 0 : i32
    %c0_i32_0 = arith.constant 0 : i32
    %c0_i32_1 = arith.constant 0 : i32
    return %c0_i32, %c0_i32_0 : i32, i32
  }
  func.func @transform_19(%arg0: i32) -> (i32, i32) {
    %c0_i32 = arith.constant 0 : i32
    %c0_i32_0 = arith.constant 0 : i32
    %c0_i32_1 = arith.constant 0 : i32
    return %c0_i32, %c0_i32_0 : i32, i32
  }
  func.func @transform_20(%arg0: i32) -> (i32, i32) {
    %c0_i32 = arith.constant 0 : i32
    %c0_i32_0 = arith.constant 0 : i32
    %c0_i32_1 = arith.constant 0 : i32
    return %c0_i32, %c0_i32_0 : i32, i32
  }
  func.func @transform_21(%arg0: i32) -> (i32, i32) {
    %c0_i32 = arith.constant 0 : i32
    %c0_i32_0 = arith.constant 0 : i32
    %c0_i32_1 = arith.constant 0 : i32
    return %c0_i32, %c0_i32_0 : i32, i32
  }
  func.func @transform_22(%arg0: i32) -> (i32, i32) {
    %c0_i32 = arith.constant 0 : i32
    %c0_i32_0 = arith.constant 0 : i32
    %c0_i32_1 = arith.constant 0 : i32
    return %c0_i32, %c0_i32_0 : i32, i32
  }
  func.func @transform_23(%arg0: i32) -> (i32, i32) {
    %c0_i32 = arith.constant 0 : i32
    %c0_i32_0 = arith.constant 0 : i32
    %c0_i32_1 = arith.constant 0 : i32
    return %c0_i32, %c0_i32_0 : i32, i32
  }
  func.func @transform_24(%arg0: i32) -> (i32, i32) {
    %c0_i32 = arith.constant 0 : i32
    %c0_i32_0 = arith.constant 0 : i32
    %c0_i32_1 = arith.constant 0 : i32
    return %c0_i32, %c0_i32_0 : i32, i32
  }
  func.func @transform_25(%arg0: i32) -> (i32, i32) {
    %c0_i32 = arith.constant 0 : i32
    %c0_i32_0 = arith.constant 0 : i32
    return %arg0, %c0_i32 : i32, i32
  }
}

</mosaic_0001>

<bundles_post_ra>
// kernel: tile.19
= control target key start
LH: loop header
LB: loop body
LE: loop exit
PB: predicated region body
PF: predicated region fallthrough
CT: control target
= control target key end

     0   :  { %vm36_vm0 = vcmask 1047556   ;;  %s81_s22 = smov 8   ;;  %s82_s23 = smov 16   ;;  %vm38_vm1 = vcmask 64512   ;;  %vm48_vm2 = vcmask 261312   ;;  %vm58_vm3 = vcmask 195712   ;;  %s133_s0 = inlined_call_operand.vmem [shape: f32[8,4,8], index: 0, kind: input, shape index: {}]   ;;  %s134_s1 = inlined_call_operand.vmem [shape: f32[8,32], index: 1, kind: output, shape index: {}]  }
   0x1   :  { %v70_v0 = vld [vmem:[%s133_s0 + $0x1c] sm:$0xf]  ;;  %v71_v1 = vld [vmem:[%s133_s0 + $0x18] sm:$0xf]  ;;  %v72_v2 = vld [vmem:[%s133_s0 + $0x14] sm:$0xf] }
   0x2   :  { %7 = vst [vmem:[#allocation0 + $0x38] sm:$0xf] %v70_v0  ;;  %v73_v3 = vld [vmem:[%s133_s0 + $0x10] sm:$0xf]  ;;  %v74_v4 = vld [vmem:[%s133_s0 + $0xc] sm:$0xf] }
   0x3   :  { %11 = vst [vmem:[#allocation0 + $0x30] sm:$0xf] %v71_v1  ;;  %v75_v5 = vld [vmem:[%s133_s0 + $0x8] sm:$0xf]  ;;  %v76_v6 = vld [vmem:[%s133_s0 + $0x4] sm:$0xf] }
   0x4   :  { %15 = vst [vmem:[#allocation0 + $0x28] sm:$0xf] %v72_v2  ;;  %v32_v7 = vld [vmem:[%s133_s0] sm:$0xf]  ;;  %s80_s0 = smov 24   ;;  %vm68_vm4 = vcmask 130112  }
   0x5   :  { %19 = vst [vmem:[#allocation0 + $0x20] sm:$0xf] %v73_v3 }
   0x6   :  { %23 = vst [vmem:[#allocation0 + $0x18] sm:$0xf] %v74_v4 }
   0x7   :  { %27 = vst [vmem:[#allocation0 + $0x10] sm:$0xf] %v75_v5 }
   0x8   :  { %31 = vst [vmem:[#allocation0 + $0x8] sm:$0xf] %v76_v6 }
   0x9   :  { %33 = vst [vmem:[#allocation0] sm:$0xf] %v32_v7 }
   0xc   :  { %v43_v8 = vld [vmem:[#allocation0 + $0x3] ss:$8 sm:$0xf0]   ;;  %v63_v9 = vld [vmem:[#allocation0 + $0x1] ss:$8 sm:$0xf0]  }
   0xd   :  { %v53_v15 = vld [vmem:[#allocation0 + $0x2] ss:$8 sm:$0xf0]   ;;  %v35_v18 = vld [vmem:[#allocation0] ss:$8 sm:$0xf0]  }
  0x10   :  { %v41_v10 = vld [vmem:[#allocation0 + $0x3] ss:$8 sm:$0xf]   ;;  %v61_v12 = vld [vmem:[#allocation0 + $0x1] ss:$8 sm:$0xf]  }
  0x11   :  { %v45_v11 = vsel %vm36_vm0, %v43_v8, %v41_v10  ;;  %v65_v13 = vsel %vm36_vm0, %v63_v9, %v61_v12  ;;  %v51_v14 = vld [vmem:[#allocation0 + $0x2] ss:$8 sm:$0xf]   ;;  %v34_v17 = vld [vmem:[#allocation0] ss:$8 sm:$0xf]  }
  0x12   :  { %46 = vrot.lane.b32.xlu0 %v45_v11, %s80_s0  ;;  %66 = vrot.lane.b32.xlu1 %v65_v13, %s81_s22  ;;  %v55_v16 = vsel %vm36_vm0, %v53_v15, %v51_v14  ;;  %v37_v19 = vsel %vm36_vm0, %v35_v18, %v34_v17 }
  0x13   :  { %39 = vst.msk [vmem:[%s134_s1] sm:$0xff] %vm38_vm1, %v37_v19  }
  0x1a   :  { %56 = vrot.lane.b32.xlu0 %v55_v16, %s82_s23 }
  0x84   :  { %v47_v20 = vpop.permute.xlu0 %46   ;;  %v67_v21 = vpop.permute.xlu1 %66  }
  0x85   :  { %49 = vst.msk [vmem:[%s134_s1] sm:$0xff] %vm48_vm2, %v47_v20  }
  0x8c   :  { %v57_v22 = vpop.permute.xlu0 %56  }
  0x8d   :  { %59 = vst.msk [vmem:[%s134_s1] sm:$0xff] %vm58_vm3, %v57_v22  }
  0x8e   :  { %69 = vst.msk [vmem:[%s134_s1] sm:$0xff] %vm68_vm4, %v67_v21  }

// kernel: esm2_forward.1
= control target key start
LH: loop header
LB: loop body
LE: loop exit
PB: predicated region body
PF: predicated region fallthrough
CT: control target
= control target key end

     0   :  { %s2861_s29 = smov 0   ;;  %s3308_s0 = inlined_call_operand.vmem [shape: f32[16,32], index: 0, kind: input, shape index: {}]   ;;  %s3309_s1 = inlined_call_operand.vmem [shape: f32[2,1,8], index: 1, kind: input, shape index: {}]   ;;  %s3310_s2 = inlined_call_operand.vmem [shape: f32[8,32], index: 2, kind: input, shape index: {}]   ;;  %s3311_s3 = inlined_call_operand.vmem [shape: f32[8,32], index: 3, kind: input, shape index: {}]   ;;  %s3312_s4 = inlined_call_operand.vmem [shape: bf16[32,32], index: 4, kind: input, shape index: {}]   ;;  %s3313_s5 = inlined_call_operand.vmem [shape: bf16[2,32,96], index: 5, kind: input, shape index: {}]   ;;  %s3314_s6 = inlined_call_operand.vmem [shape: f32[2,1,96], index: 6, kind: input, shape index: {}]   ;;  %s3315_s7 = inlined_call_operand.vmem [shape: bf16[2,32,32], index: 7, kind: input, shape index: {}]   ;;  %s3316_s8 = inlined_call_operand.vmem [shape: f32[2,1,32], index: 8, kind: input, shape index: {}]   ;;  %s3317_s9 = inlined_call_operand.vmem [shape: f32[2,1,32], index: 9, kind: input, shape index: {}]   ;;  %s3318_s10 = inlined_call_operand.vmem [shape: f32[2,1,32], index: 10, kind: input, shape index: {}]   ;;  %s3319_s11 = inlined_call_operand.vmem [shape: f32[2,1,32], index: 11, kind: input, shape index: {}]   ;;  %s3320_s12 = inlined_call_operand.vmem [shape: f32[2,1,32], index: 12, kind: input, shape index: {}]   ;;  %s3321_s13 = inlined_call_operand.vmem [shape: bf16[2,32,128], index: 13, kind: input, shape index: {}]   ;;  %s3322_s14 = inlined_call_operand.vmem [shape: f32[2,1,128], index: 14, kind: input, shape index: {}]   ;;  %s3323_s15 = inlined_call_operand.vmem [shape: bf16[2,128,32], index: 15, kind: input, shape index: {}]   ;;  %s3324_s16 = inlined_call_operand.vmem [shape: f32[2,1,32], index: 16, kind: input, shape index: {}]   ;;  %s3325_s17 = inlined_call_operand.vmem [shape: f32[1,32], index: 17, kind: input, shape index: {}]   ;;  %s3326_s18 = inlined_call_operand.vmem [shape: f32[1,32], index: 18, kind: input, shape index: {}]   ;;  %s3327_s19 = inlined_call_operand.vmem [shape: bf16[32,32], index: 19, kind: input, shape index: {}]   ;;  %s3328_s20 = inlined_call_operand.vmem [shape: f32[1,32], index: 20, kind: input, shape index: {}]   ;;  %s3329_s21 = inlined_call_operand.vmem [shape: f32[1,32], index: 21, kind: input, shape index: {}]   ;;  %s3330_s22 = inlined_call_operand.vmem [shape: f32[1,32], index: 22, kind: input, shape index: {}]   ;;  %s3331_s23 = inlined_call_operand.vmem [shape: bf16[32,128], index: 23, kind: input, shape index: {}]   ;;  %s3332_s24 = inlined_call_operand.vmem [shape: f32[1,128], index: 24, kind: input, shape index: {}]   ;;  %s3333_s25 = inlined_call_operand.vmem [shape: f32[16,128], index: 25, kind: output, shape index: {}]  }
   0x1   :  { %3358 = sst [smem:[#allocation2_spill]] %s3308_s0 }
   0x2   :  { %3359 = sst [smem:[#allocation3_spill]] %s3309_s1 }
   0x3   :  { %3360 = sst [smem:[#allocation4_spill]] %s3310_s2 }
   0x4   :  { %3361 = sst [smem:[#allocation5_spill]] %s3311_s3 }
   0x5   :  { %3362 = sst [smem:[#allocation6_spill]] %s3312_s4 }
   0x6   :  { %3363 = sst [smem:[#allocation7_spill]] %s3313_s5 }
   0x7   :  { %3364 = sst [smem:[#allocation8_spill]] %s3314_s6 }
   0x8   :  { %3365 = sst [smem:[#allocation9_spill]] %s3315_s7 }
   0x9   :  { %3366 = sst [smem:[#allocation10_spill]] %s3316_s8 }
   0xa   :  { %3367 = sst [smem:[#allocation11_spill]] %s3317_s9 }
   0xb LB: > { %s2356_s2 = sadd.s32 4294967295, %s2711_s29   ;;  %p2360_p0 = scmp.ge.s32.totalorder %s2711_s29, 1  ;;  %s2711_s29 = sphi %s2861_s29, %s35_s29  }
   0xc   : > { %p694_p1 = scmp.lt.s32.totalorder %s2711_s29, 3 }
   0xe   : > { %p695_p2 = pnand %p2360_p0, %p694_p1 }
   0xf   : > { %p763_p3 = scmp.lt.s32.totalorder (!%p695_p2), %s2356_s2, 1  ;;  %s3368_s3 = sld [smem:[#allocation2_spill]] (!%p695_p2) }
  0x10   : > { %698 = sbr.rel (%p695_p2) target bundleno = 5415 (0x1527), region = 120  ;;  %s3369_s27 = sld [smem:[#allocation7_spill]] (!%p695_p2) }
  0x11   : > { %s3370_s0 = sld [smem:[#allocation6_spill]] (!%p695_p2)  ;;  %s3355_s30 = smov (!%p695_p2), 96  }
  0x12   : > { %s3372_s5 = sld [smem:[#allocation8_spill]] (!%p695_p2)  ;;  %s3354_s8 = smov (!%p695_p2), 32  }
  0x13   : > { %s3373_s1 = sld [smem:[#allocation4_spill]] (!%p695_p2)  ;;  %s3350_s7 = smov (!%p695_p2), 120  }
  0x14   : > { %s3374_s9 = sld [smem:[#allocation5_spill]] (!%p695_p2)  ;;  %s3343_s4 = smov (!%p695_p2), 80  }
  0x15   : > { %s3397_s2 = smov (!%p763_p3, %s2356_s2), 1  ;;  %vm785_vm0 = vcmask 261120   ;;  %v2713_v2 = vmov 32.0   ;;  %v2626_v29 = vld [vmem:[%s3318_s10] ss:$0 sm:$0xff]  ;;  %s3349_s28 = smov 104  }
  0x16   : > { %s3340_s6 = sshll.u32 %s3397_s2, 3  ;;  %2647 = vrcp.f32 %v2713_v2  ;;  %v2568_v14 = vld [vmem:[%s3369_s27 + $0x8] sm:$0xff]  ;;  %v2567_v15 = vld [vmem:[%s3369_s27] sm:$0xff]  ;;  %vm927_vm5 = vcmask 64512   ;;  %vm982_vm8 = vcmask 1043456  }
  0x17   : > { %s766_s26 = scalar_lea.vmem %s3368_s3, %s3340_s6  ;;  %853 = vmatpush.bf16.msra.mxu3 %v2568_v14  ;;  %v2895_v16 = vld [vmem:[%s3370_s0 + $0x8] sm:$0xff]  ;;  %s3371_s3 = sld [smem:[#allocation11_spill]]  ;;  %v2910_v33 = vld [vmem:[%s3370_s0] sm:$0xff] }
  0x18   : > { %v2877_v0 = vld [vmem:[%s766_s26] sm:$0xff]  ;;  %883 = vmatpush.bf16.msra.mxu1 %v2895_v16  ;;  %909 = vmatpush.bf16.msra.mxu2 %v2895_v16  ;;  %s3348_s26 = smov 88   ;;  %s3344_s6 = smov 56  }
  0x19   : > { %v786_v1 = vsel %vm785_vm0, %v2877_v0, 0.0  ;;  %v2627_v34 = vld [vmem:[%s3372_s5] ss:$0 sm:$0xff]  ;;  %s3384_s0 = smov 88  }
  0x1a   : > { %787 = vadd.xlane.f32.xlu0 %v786_v1  ;;  %v2926_v39 = vld [vmem:[%s3373_s1] sm:$0xff]  ;;  %s3341_s1 = smov 72  }
  0x1b   : > { %854 = vmatpush.bf16.msra.mxu3 %v2567_v15  ;;  %v2934_v41 = vld [vmem:[%s3374_s9] sm:$0xff]  ;;  %s3342_s9 = smov 112  }
  0x1c   : > { %v2648_v3 = vpop.eup %2647  ;;  %884 = vmatpush.bf16.msra.mxu1 %v2910_v33  ;;  %910 = vmatpush.bf16.msra.mxu2 %v2910_v33 }
  0x1d   : > { %v790_v4 = vmul.f32 32.0, %v2648_v3  ;;  %vm794_vm1 = vweird.f32 %v2648_v3  ;;  %v2625_v26 = vld [vmem:[%s3371_s3] ss:$0 sm:$0xff] }
  0x1f   : > { %v791_v5 = vsub.f32 1.0, %v790_v4 }
  0x21   : > { %v792_v6 = vmul.f32 %v2648_v3, %v791_v5  ;;  %v2722_v5 = vmov 0  }
  0x23   : > { %v793_v7 = vadd.f32 %v2648_v3, %v792_v6 }
  0x25   : > { %v2881_v8 = vsel %vm794_vm1, %v2648_v3, %v793_v7 }
  0x8d   : > { %v788_v9 = vpop.xlane.xlu0 %787 }
  0x8e   : > { %v796_v10 = vmul.f32 %v2881_v8, %v788_v9 }
  0x90   : > { %v797_v11 = vsub.f32 %v2877_v0, %v796_v10 }
  0x92   : > { %v798_v12 = vmul.f32 %v797_v11, %v797_v11 }
  0x94   : > { %v799_v13 = vsel %vm785_vm0, %v798_v12, 0.0 }
  0x95   : > { %800 = vadd.xlane.f32.xlu0 %v799_v13 }
 0x108   : > { %v801_v17 = vpop.xlane.xlu0 %800 }
 0x109   : > { %v802_v18 = vmul.f32 %v801_v17, %v2881_v8 }
 0x10b   : > { %v803_v19 = vadd.f32 1e-05, %v802_v18 }
 0x10d   : > { %2649 = vrsqrt.f32 %v803_v19  ;;  %vm810_vm3 = vweird.f32 %v803_v19 }
 0x113   : > { %v2650_v20 = vpop.eup %2649 }
 0x114   : > { %v805_v21 = vmul.f32 %v2650_v20, %v803_v19  ;;  %vm811_vm2 = vweird.f32 %v2650_v20 }
 0x115   : > { %vm812_vm4 = vmor %vm810_vm3, %vm811_vm2 }
 0x116   : > { %v806_v22 = vmul.f32 %v2650_v20, %v805_v21 }
 0x118   : > { %v807_v23 = vmul.f32 0.5, %v806_v22 }
 0x11a   : > { %v808_v24 = vsub.f32 1.5, %v807_v23 }
 0x11c   : > { %v809_v25 = vmul.f32 %v2650_v20, %v808_v24 }
 0x11e   : > { %v813_v27 = vsel %vm812_vm4, %v2650_v20, %v809_v25 }
 0x11f   : > { %v814_v28 = vmul.f32 %v813_v27, %v797_v11 }
 0x121   : > { %v818_v30 = vmul.f32 %v2625_v26, %v814_v28 }
 0x123   : > { %v822_v31 = vadd.f32 %v2626_v29, %v818_v30 }
 0x125   : > { %v827_v32 = vpack.c.bf16 %v822_v31, %v822_v31 }
 0x127   : > { %2371 = vmatmul.msk.bf16.vlgmr.msra.gmra.mxu3 %vm785_vm0, %v827_v32 }
 0x1aa   : > { %v856_v35 = vpop.f32.mrf.mxu3 }
 0x1ab   : > { %v857_v36 = vadd.f32 %v2627_v34, %v856_v35 }
 0x1ad   : > { %v2917_v37 = vpack.c.bf16 %v857_v36, %v857_v36  ;;  %v860_v43 = vmul.f32 %v857_v36, %v2926_v39 }
 0x1af   : > { %898 = vrot.lane.b32.xlu1 %v2917_v37, %s3355_s30  ;;  %2380 = vmatmul.msk.bf16.vlgmr.msra.gmra.mxu1 %vm785_vm0, %v2917_v37 }
 0x1b2   : > { %v858_v38 = vpop.f32.mrf.mxu3 }
 0x1b7   : > { %893 = vrot.lane.b32.xlu1 %v2926_v39, %s3354_s8 }
 0x221   : > { %v899_v40 = vpop.permute.xlu1 %898 }
 0x222   : > { %2381 = vmatmul.msk.bf16.vlgmr.msra.gmra.mxu2 %vm785_vm0, %v899_v40 }
 0x229   : > { %v2941_v51 = vpop.permute.xlu1 %893 }
 0x22a   : > { %v896_v52 = vmul.f32 %v2941_v51, %v857_v36 }
 0x22c   : > { %v886_v42 = vpop.f32.mrf.mxu1 }
 0x22d   : > { %v890_v44 = vmul.f32 %v886_v42, %v2934_v41 }
 0x22f   : > { %v891_v45 = vadd.f32 %v890_v44, %v860_v43 }
 0x231   : > { %v922_v46 = vpack.c.bf16 %v891_v45, %v891_v45 }
 0x233   : > { %1000 = vrot.lane.b32.xlu1 %v922_v46, %s3350_s7  ;;  %s3380_s7 = smov 96  }
 0x234   : > { %v888_v47 = vpop.f32.mrf.mxu1 }
 0x2a5   : > { %v912_v48 = vpop.f32.mrf.mxu2  ;;  %v1001_v60 = vpop.permute.xlu1 %1000 }
 0x2a6   : > { %v916_v49 = vmul.f32 %v912_v48, %v2934_v41 }
 0x2a8   : > { %918 = vrot.lane.b32.xlu2 %v916_v49, %s3354_s8  ;;  %s3382_s8 = smov 120  }
 0x2ad   : > { %v914_v50 = vpop.f32.mrf.mxu2 }
 0x302   : > { %v919_v53 = vpop.permute.xlu2 %918 }
 0x303   : > { %v921_v54 = vadd.f32 %v919_v53, %v896_v52 }
 0x305   : > { %v923_v55 = vpack.c.bf16 %v921_v54, %v921_v54 }
 0x307   : > { %1002 = vrot.lane.b32.xlu0 %v923_v55, %s3348_s26  ;;  %925 = vrot.lane.b32.xlu2 %v923_v55, %s3355_s30  ;;  %s3381_s26 = smov 32   ;;  %s3385_s30 = smov 80  }
 0x308   : > { %1142 = vrot.lane.b32.xlu1 %v923_v55, %s3341_s1  ;;  %s3345_s1 = smov 48  }
 0x30f   : > { %1072 = vrot.lane.b32.xlu2 %v923_v55, %s3343_s4 }
 0x310   : > { %1140 = vrot.lane.b32.xlu1 %v922_v46, %s3349_s28  ;;  %s3378_s28 = sld [smem:[#allocation9_spill]] }
 0x317   : > { %1070 = vrot.lane.b32.xlu2 %v922_v46, %s3342_s9  ;;  %s3375_s9 = sld [smem:[#allocation3_spill]] }
 0x31d   : > { %s769_s4 = scalar_lea.vmem %s3375_s9, %s3397_s2  ;;  %s3347_s9 = smov 64  }
 0x31e   : > { %v776_v4 = vld [vmem:[%s769_s4] sm:$0x1]  ;;  %s3346_s4 = smov 40  }
 0x31f   : > { %vm947_vm6 = vcmp.gt.f32.partialorder %v776_v4, 0.5 }
 0x320   : > { %v948_v6 = vsel %vm947_vm6, 1, %v2722_v5 }
 0x321   : > { %v949_v7 = vperm.slane %v948_v6, 0 }
 0x323   : > { %vm2962_vm7 = vcmp.eq.s32.totalorder %v949_v7, 1 }
 0x361   : > { %v926_v56 = vpop.permute.xlu2 %925 }
 0x362   : > { %v932_v57 = vsel %vm927_vm5, %v926_v56, 0 }
 0x363   : > { %941 = vmatpush.bf16.xpose.msrb.mxu3 %v932_v57 }
 0x369   : > { %v1073_v58 = vpop.permute.xlu2 %1072 }
 0x36a   : > { %v1078_v59 = vsel %vm927_vm5, %v1073_v58, 0  ;;  %2382 = vmatmul.msk.bf16.vlgmr.msrb.gmra.mxu3 %vm927_vm5, %v922_v46 }
 0x36b   : > { %1087 = vmatpush.bf16.xpose.msra.mxu3 %v1078_v59 }
 0x371   : > { %v1071_v61 = vpop.permute.xlu2 %1070 }
 0x379   : > { %v1003_v62 = vpop.permute.xlu0 %1002 }
 0x37a   : > { %v1143_v63 = vpop.permute.xlu1 %1142  ;;  %2386 = vmatmul.msk.bf16.vlgmr.msra.gmra.mxu3 %vm927_vm5, %v1071_v61  ;;  %v1008_v1 = vsel %vm927_vm5, %v1003_v62, 0 }
 0x37b   : > { %v1148_v2 = vsel %vm927_vm5, %v1143_v63, 0  ;;  %1017 = vmatpush.bf16.xpose.msrb.mxu1 %v1008_v1 }
 0x382   : > { %2384 = vmatmul.msk.bf16.vlgmr.msrb.gmra.mxu1 %vm927_vm5, %v1001_v60  ;;  %v1141_v3 = vpop.permute.xlu1 %1140 }
 0x383   : > { %1157 = vmatpush.bf16.xpose.msra.mxu1 %v1148_v2 }
 0x392   : > { %2388 = vmatmul.msk.bf16.vlgmr.msra.gmra.mxu1 %vm927_vm5, %v1141_v3 }
 0x3ed   : > { %v943_v10 = vpop.f32.mrf.mxu3 }
 0x3ee   : > { %v951_v11 = vsel %vm2962_vm7, -1e+30, %v943_v10 }
 0x3ef   : > { %v952_v12 = vsel %vm927_vm5, %v951_v11, -inf }
 0x3f0   : > { %953 = vmax.xlane.f32.xlu0 %v952_v12 }
 0x3f5   : > { %v945_v13 = vpop.f32.mrf.mxu3 }
 0x3fd   : > { %v1089_v14 = vpop.f32.mrf.mxu3 }
 0x3fe   : > { %v1093_v20 = vsel %vm2962_vm7, -1e+30, %v1089_v14 }
 0x3ff   : > { %v1019_v15 = vpop.f32.mrf.mxu1  ;;  %v1094_v22 = vsel %vm927_vm5, %v1093_v20, -inf }
 0x400   : > { %v1023_v17 = vsel %vm2962_vm7, -1e+30, %v1019_v15 }
 0x401   : > { %v1024_v18 = vsel %vm927_vm5, %v1023_v17, -inf }
 0x402   : > { %1025 = vmax.xlane.f32.xlu2 %v1024_v18 }
 0x404   : > { %1049 = vrot.lane.b32.xlu0 %v2917_v37, %s3344_s6  ;;  %s3351_s6 = smov 8  }
 0x405   : > { %v1091_v19 = vpop.f32.mrf.mxu3 }
 0x407   : > { %v1021_v21 = vpop.f32.mrf.mxu1 }
 0x40a   : > { %1095 = vmax.xlane.f32.xlu2 %v1094_v22 }
 0x40f   : > { %v1159_v23 = vpop.f32.mrf.mxu1 }
 0x410   : > { %v1163_v24 = vsel %vm2962_vm7, -1e+30, %v1159_v23 }
 0x411   : > { %v1164_v25 = vsel %vm927_vm5, %v1163_v24, -inf }
 0x412   : > { %1165 = vmax.xlane.f32.xlu1 %v1164_v25 }
 0x417   : > { %v1161_v26 = vpop.f32.mrf.mxu1 }
 0x463   : > { %v954_v27 = vpop.xlane.xlu0 %953 }
 0x464   : > { %v955_v28 = vsub.f32 %v951_v11, %v954_v27 }
 0x466   : > { %v956_v29 = vmul.f32 1.442695, %v955_v28 }
 0x468   : > { %2651 = vpow2.f32 %v956_v29 }
 0x46e   : > { %v2980_v30 = vpop.eup %2651 }
 0x46f   : > { %v958_v31 = vsel %vm927_vm5, %v2980_v30, 0.0 }
 0x470   : > { %959 = vadd.xlane.f32.xlu2 %v958_v31 }
 0x475   : > { %v1026_v32 = vpop.xlane.xlu2 %1025 }
 0x476   : > { %v1027_v34 = vsub.f32 %v1023_v17, %v1026_v32  ;;  %v1050_v35 = vpop.permute.xlu0 %1049 }
 0x477   : > { %v1055_v36 = vsel %vm982_vm8, %v1050_v35, 0 }
 0x478   : > { %v1028_v38 = vmul.f32 1.442695, %v1027_v34  ;;  %1064 = vmatpush.bf16.msrb.mxu2 %v1055_v36 }
 0x47a   : > { %2653 = vpow2.f32 %v1028_v38 }
 0x47d   : > { %v1096_v40 = vpop.xlane.xlu2 %1095 }
 0x47e   : > { %v1097_v42 = vsub.f32 %v1093_v20, %v1096_v40 }
 0x480   : > { %v2654_v43 = vpop.eup %2653  ;;  %v1098_v44 = vmul.f32 1.442695, %v1097_v42 }
 0x481   : > { %v1030_v45 = vsel %vm927_vm5, %v2654_v43, 0.0 }
 0x482   : > { %2655 = vpow2.f32 %v1098_v44  ;;  %1031 = vadd.xlane.f32.xlu0 %v1030_v45 }
 0x485   : > { %v1166_v46 = vpop.xlane.xlu1 %1165 }
 0x486   : > { %v1167_v47 = vsub.f32 %v1163_v24, %v1166_v46 }
 0x488   : > { %v2986_v48 = vpop.eup %2655  ;;  %v1168_v49 = vmul.f32 1.442695, %v1167_v47 }
 0x489   : > { %v1100_v50 = vsel %vm927_vm5, %v2986_v48, 0.0 }
 0x48a   : > { %2657 = vpow2.f32 %v1168_v49  ;;  %1101 = vadd.xlane.f32.xlu2 %v1100_v50 }
 0x490   : > { %v2990_v52 = vpop.eup %2657 }
 0x491   : > { %v1170_v53 = vsel %vm927_vm5, %v2990_v52, 0.0 }
 0x492   : > { %1171 = vadd.xlane.f32.xlu1 %v1170_v53 }
 0x496   : > { %1119 = vrot.lane.b32.xlu0 %v2917_v37, %s3345_s1  ;;  %s3352_s1 = smov 24  }
 0x4a2   : > { %1189 = vrot.lane.b32.xlu2 %v2917_v37, %s3346_s4  ;;  %s3353_s4 = smov 16  }
 0x4ab   : > { %977 = vrot.lane.b32.xlu1 %v2917_v37, %s3347_s9  ;;  %s3387_s9 = smov 72  }
 0x4e3   : > { %v960_v54 = vpop.xlane.xlu2 %959 }
 0x4e4   : > { %v972_v23 = vand.u32 2147483648, %v960_v54  ;;  %vm966_vm1 = vweird.f32 %v960_v54  ;;  %v970_v26 = vand.u32 2147483647, %v960_v54 }
 0x4e6   : > { %v973_v32 = vor.u32 1.1754944e-38, %v972_v23  ;;  %vm971_vm6 = vcmp.eq.f32.partialorder %v970_v26, 8.507059e+37  ;;  %v2571_v23 = vld [vmem:[%s3321_s13] sm:$0xff] }
 0x4f5   : > { %v1032_v55 = vpop.xlane.xlu0 %1031 }
 0x4f6   : > { %2659 = vrcp.f32 %v1032_v55  ;;  %v1044_v61 = vand.u32 2147483648, %v1032_v55  ;;  %v1042_v62 = vand.u32 2147483647, %v1032_v55  ;;  %vm1038_vm10 = vweird.f32 %v1032_v55 }
 0x4f7   : > { %2661 = vrcp.f32 %v960_v54 }
 0x4f8   : > { %v1045_v2 = vor.u32 1.1754944e-38, %v1044_v61  ;;  %vm1043_vm12 = vcmp.eq.f32.partialorder %v1042_v62, 8.507059e+37 }
 0x4fc   : > { %v2660_v56 = vpop.eup %2659 }
 0x4fd   : > { %v1034_v57 = vmul.f32 %v2660_v56, %v1032_v55  ;;  %v3000_v58 = vpop.xlane.xlu2 %1101  ;;  %vm1039_vm9 = vweird.f32 %v2660_v56  ;;  %v2662_v63 = vpop.eup %2661 }
 0x4fe   : > { %vm1040_vm11 = vmor %vm1038_vm10, %vm1039_vm9  ;;  %v962_v5 = vmul.f32 %v2662_v63, %v960_v54  ;;  %vm967_vm14 = vweird.f32 %v2662_v63  ;;  %v1114_v50 = vand.u32 2147483648, %v3000_v58  ;;  %vm1108_vm10 = vweird.f32 %v3000_v58 }
 0x4ff   : > { %v1035_v59 = vsub.f32 1.0, %v1034_v57  ;;  %vm968_vm3 = vmor %vm966_vm1, %vm967_vm14  ;;  %vm1225_vm14 = vcmask 195584  }
 0x500   : > { %v963_v11 = vsub.f32 1.0, %v962_v5  ;;  %v1115_v53 = vor.u32 1.1754944e-38, %v1114_v50 }
 0x501   : > { %v1036_v60 = vmul.f32 %v2660_v56, %v1035_v59 }
 0x502   : > { %v964_v15 = vmul.f32 %v2662_v63, %v963_v11 }
 0x503   : > { %v1037_v1 = vadd.f32 %v2660_v56, %v1036_v60 }
 0x504   : > { %v965_v21 = vadd.f32 %v2662_v63, %v964_v15 }
 0x505   : > { %v1172_v3 = vpop.xlane.xlu1 %1171  ;;  %v1190_v37 = vpop.permute.xlu2 %1189  ;;  %v1041_v4 = vsel %vm1040_vm11, %v2660_v56, %v1037_v1  ;;  %v2570_v1 = vld [vmem:[%s3378_s28 + $0x8] sm:$0xff] }
 0x506   : > { %2663 = vrcp.f32 %v1172_v3  ;;  %v1195_v6 = vsel %vm982_vm8, %v1190_v37, 0  ;;  %v1046_v7 = vsel %vm1043_vm12, %v1045_v2, %v1041_v4  ;;  %v1184_v18 = vand.u32 2147483648, %v1172_v3  ;;  %1253 = vmatpush.bf16.msrb.mxu3 %v2570_v1  ;;  %v2569_v2 = vld [vmem:[%s3378_s28] sm:$0xff] }
 0x507   : > { %1204 = vmatpush.bf16.msra.mxu2 %v1195_v6  ;;  %v1047_v10 = vmul.f32 %v2654_v43, %v1046_v7  ;;  %2665 = vrcp.f32 %v3000_v58  ;;  %v1182_v20 = vand.u32 2147483647, %v1172_v3  ;;  %vm1178_vm15 = vweird.f32 %v1172_v3  ;;  %v2573_v1 = vld [vmem:[%s3323_s15] sm:$0xff] }
 0x508   : > { %v1185_v25 = vor.u32 1.1754944e-38, %v1184_v18  ;;  %v969_v31 = vsel %vm968_vm3, %v2662_v63, %v965_v21  ;;  %v1120_v40 = vpop.permute.xlu0 %1119 }
 0x509   : > { %v1048_v12 = vpack.c.bf16 %v1047_v10, %v1047_v10  ;;  %vm1183_vm4 = vcmp.eq.f32.partialorder %v1182_v20, 8.507059e+37  ;;  %v974_v36 = vsel %vm971_vm6, %v973_v32, %v969_v31  ;;  %v1125_v46 = vsel %vm982_vm8, %v1120_v40, 0 }
 0x50a   : > { %v975_v42 = vmul.f32 %v2980_v30, %v974_v36  ;;  %1254 = vmatpush.bf16.msrb.mxu3 %v2569_v2 }
 0x50b   : > { %2385 = vmatmul.msk.bf16.vlgmr.msrb.gmra.mxu2 %vm927_vm5, %v1048_v12 }
 0x50c   : > { %v2664_v13 = vpop.eup %2663  ;;  %v976_v47 = vpack.c.bf16 %v975_v42, %v975_v42 }
 0x50d   : > { %v1174_v14 = vmul.f32 %v2664_v13, %v1172_v3  ;;  %vm1179_vm13 = vweird.f32 %v2664_v13  ;;  %v2666_v22 = vpop.eup %2665 }
 0x50e   : > { %vm1180_vm2 = vmor %vm1178_vm15, %vm1179_vm13  ;;  %v1104_v28 = vmul.f32 %v2666_v22, %v3000_v58  ;;  %vm1109_vm9 = vweird.f32 %v2666_v22  ;;  %1543 = vmatpush.bf16.msra.mxu3 %v2895_v16  ;;  %vm1223_vm13 = vcmask 130048  }
 0x50f   : > { %v1175_v17 = vsub.f32 1.0, %v1174_v14  ;;  %vm1110_vm11 = vmor %vm1108_vm10, %vm1109_vm9 }
 0x510   : > { %v1105_v38 = vsub.f32 1.0, %v1104_v28 }
 0x511   : > { %v1176_v19 = vmul.f32 %v2664_v13, %v1175_v17 }
 0x512   : > { %v1106_v44 = vmul.f32 %v2666_v22, %v1105_v38  ;;  %1544 = vmatpush.bf16.msra.mxu3 %v2910_v33 }
 0x513   : > { %v1177_v24 = vadd.f32 %v2664_v13, %v1176_v19 }
 0x514   : > { %v1107_v49 = vadd.f32 %v2666_v22, %v1106_v44  ;;  %v2631_v44 = vld [vmem:[%s3322_s14] ss:$0 sm:$0xff] }
 0x515   : > { %v1181_v27 = vsel %vm1180_vm2, %v2664_v13, %v1177_v24 }
 0x516   : > { %v1186_v29 = vsel %vm1183_vm4, %v1185_v25, %v1181_v27  ;;  %v1111_v30 = vsel %vm1110_vm11, %v2666_v22, %v1107_v49  ;;  %v2578_v49 = vld [vmem:[%s3323_s15 + $0x28] sm:$0xff] }
 0x517   : > { %v1187_v34 = vmul.f32 %v2990_v52, %v1186_v29  ;;  %v1112_v52 = vand.u32 2147483647, %v3000_v58 }
 0x519   : > { %v1188_v35 = vpack.c.bf16 %v1187_v34, %v1187_v34  ;;  %vm1113_vm12 = vcmp.eq.f32.partialorder %v1112_v52, 8.507059e+37 }
 0x51a   : > { %v1116_v54 = vsel %vm1113_vm12, %v1115_v53, %v1111_v30  ;;  %v2577_v30 = vld [vmem:[%s3323_s15 + $0x20] sm:$0xff] }
 0x51b   : > { %2389 = vmatmul.msk.bf16.vlgmr.msra.gmra.mxu2 %vm927_vm5, %v1188_v35  ;;  %v1117_v55 = vmul.f32 %v2986_v48, %v1116_v54  ;;  %v2629_v35 = vld [vmem:[%s3319_s11] ss:$0 sm:$0xff] }
 0x51d   : > { %v978_v43 = vpop.permute.xlu1 %977  ;;  %v1118_v56 = vpack.c.bf16 %v1117_v55, %v1117_v55 }
 0x51e   : > { %v984_v45 = vsel %vm982_vm8, %v978_v43, 0  ;;  %v2580_v43 = vld [vmem:[%s3323_s15 + $0x38] sm:$0xff] }
 0x51f   : > { %993 = vmatpush.bf16.msra.mxu0 %v984_v45  ;;  %1440 = vmatpush.bf16.msrb.mxu1 %v2580_v43  ;;  %v2579_v45 = vld [vmem:[%s3323_s15 + $0x30] sm:$0xff] }
 0x522   : > { %2383 = vmatmul.msk.bf16.vlgmr.msra.gmra.mxu0 %vm927_vm5, %v976_v47 }
 0x523   : > { %1134 = vmatpush.bf16.msrb.mxu0 %v1125_v46  ;;  %1441 = vmatpush.bf16.msrb.mxu1 %v2579_v45 }
 0x527   : > { %1442 = vmatpush.bf16.msrb.mxu1 %v2578_v49 }
 0x52b   : > { %1443 = vmatpush.bf16.msrb.mxu1 %v2577_v30 }
 0x532   : > { %2387 = vmatmul.msk.bf16.vlgmr.msrb.gmra.mxu0 %vm927_vm5, %v1118_v56  ;;  %v2576_v56 = vld [vmem:[%s3323_s15 + $0x18] sm:$0xff] }
 0x533   : > { %1444 = vmatpush.bf16.msrb.mxu1 %v2576_v56 }
 0x58e   : > { %v1066_v57 = vpop.f32.mrf.mxu2 }
 0x58f   : > { %1211 = vrot.lane.b32.xlu0 %v1066_v57, %s3351_s6  ;;  %s3379_s6 = sld [smem:[#allocation10_spill]]  ;;  %v2575_v57 = vld [vmem:[%s3323_s15 + $0x10] sm:$0xff] }
 0x590   : > { %1445 = vmatpush.bf16.msrb.mxu1 %v2575_v57 }
 0x595   : > { %v2628_v11 = vld [vmem:[%s3379_s6] ss:$0 sm:$0xff] }
 0x596   : > { %v1068_v59 = vpop.f32.mrf.mxu2 }
 0x59e   : > { %v1206_v60 = vpop.f32.mrf.mxu2 }
 0x59f   : > { %v995_v61 = vpop.f32.mrf.mxu0  ;;  %1219 = vrot.lane.b32.xlu2 %v1206_v60, %s3352_s1  ;;  %s3386_s1 = smov 112  }
 0x5a6   : > { %v1208_v58 = vpop.f32.mrf.mxu2 }
 0x5a7   : > { %v997_v62 = vpop.f32.mrf.mxu0 }
 0x5af   : > { %v1136_v63 = vpop.f32.mrf.mxu0 }
 0x5b0   : > { %1215 = vrot.lane.b32.xlu1 %v1136_v63, %s3353_s4  ;;  %s3383_s4 = smov 104  }
 0x5b7   : > { %v1138_v48 = vpop.f32.mrf.mxu0 }
 0x5f9   : > { %v1220_v5 = vpop.permute.xlu2 %1219 }
 0x601   : > { %v1212_v3 = vpop.permute.xlu0 %1211 }
 0x602   : > { %v1222_v37 = vsel %vm927_vm5, %v995_v61, %v1212_v3  ;;  %v2574_v61 = vld [vmem:[%s3323_s15 + $0x8] sm:$0xff] }
 0x603   : > { %1446 = vmatpush.bf16.msrb.mxu1 %v2574_v61 }
 0x607   : > { %1447 = vmatpush.bf16.msrb.mxu1 %v2573_v1 }
 0x622   : > { %v1216_v4 = vpop.permute.xlu1 %1215 }
 0x623   : > { %v1224_v6 = vsel %vm1223_vm13, %v1222_v37, %v1216_v4 }
 0x624   : > { %v1226_v7 = vsel %vm1225_vm14, %v1224_v6, %v1220_v5 }
 0x625   : > { %v1231_v10 = vpack.c.bf16 %v1226_v7, %v1226_v7 }
 0x627   : > { %2398 = vmatmul.msk.bf16.vlgmr.msrb.gmra.mxu3 %vm785_vm0, %v1231_v10 }
 0x6aa   : > { %v1256_v12 = vpop.f32.mrf.mxu3 }
 0x6ab   : > { %v1260_v13 = vadd.f32 %v1256_v12, %v2877_v0  ;;  %v2572_v0 = vld [vmem:[%s3321_s13 + $0x8] sm:$0xff] }
 0x6ac   : > { %1328 = vmatpush.bf16.msra.mxu0 %v2572_v0 }
 0x6ad   : > { %v3036_v14 = vadd.f32 %v2628_v11, %v1260_v13 }
 0x6af   : > { %v1268_v15 = vsel %vm785_vm0, %v3036_v14, 0.0 }
 0x6b0   : > { %1269 = vadd.xlane.f32.xlu0 %v1268_v15  ;;  %1329 = vmatpush.bf16.msra.mxu0 %v2571_v23  ;;  %v2730_v23 = vmov -1.0  }
 0x6b2   : > { %v1258_v17 = vpop.f32.mrf.mxu3 }
 0x6b4   : > { %1565 = vmatpush.bf16.msrb.mxu0 %v2895_v16 }
 0x6b8   : > { %1566 = vmatpush.bf16.msrb.mxu0 %v2910_v33  ;;  %v2630_v33 = vld [vmem:[%s3320_s12] ss:$0 sm:$0xff] }
 0x723   : > { %v1270_v18 = vpop.xlane.xlu0 %1269 }
 0x724   : > { %v1271_v19 = vmul.f32 %v1270_v18, %v2881_v8 }
 0x726   : > { %v1272_v20 = vsub.f32 %v3036_v14, %v1271_v19 }
 0x728   : > { %v1273_v21 = vmul.f32 %v1272_v20, %v1272_v20 }
 0x72a   : > { %v1274_v22 = vsel %vm785_vm0, %v1273_v21, 0.0 }
 0x72b   : > { %1275 = vadd.xlane.f32.xlu1 %v1274_v22 }
 0x79e   : > { %v1276_v24 = vpop.xlane.xlu1 %1275 }
 0x79f   : > { %v1277_v25 = vmul.f32 %v1276_v24, %v2881_v8 }
 0x7a1   : > { %v1278_v26 = vadd.f32 1e-05, %v1277_v25 }
 0x7a3   : > { %2667 = vrsqrt.f32 %v1278_v26  ;;  %vm1285_vm1 = vweird.f32 %v1278_v26 }
 0x7a9   : > { %v2668_v27 = vpop.eup %2667 }
 0x7aa   : > { %v1280_v28 = vmul.f32 %v2668_v27, %v1278_v26  ;;  %vm1286_vm15 = vweird.f32 %v2668_v27 }
 0x7ab   : > { %vm1287_vm2 = vmor %vm1285_vm1, %vm1286_vm15 }
 0x7ac   : > { %v1281_v29 = vmul.f32 %v2668_v27, %v1280_v28 }
 0x7ae   : > { %v1282_v31 = vmul.f32 0.5, %v1281_v29 }
 0x7b0   : > { %v1283_v32 = vsub.f32 1.5, %v1282_v31  ;;  %v2632_v31 = vld [vmem:[%s3324_s16] ss:$0 sm:$0xff] }
 0x7b2   : > { %v1284_v34 = vmul.f32 %v2668_v27, %v1283_v32 }
 0x7b4   : > { %v1288_v16 = vsel %vm1287_vm2, %v2668_v27, %v1284_v34 }
 0x7b5   : > { %v1289_v36 = vmul.f32 %v1288_v16, %v1272_v20 }
 0x7b7   : > { %v1293_v38 = vmul.f32 %v2629_v35, %v1289_v36 }
 0x7b9   : > { %v1297_v40 = vadd.f32 %v2630_v33, %v1293_v38 }
 0x7bb   : > { %v1302_v42 = vpack.c.bf16 %v1297_v40, %v1297_v40 }
 0x7bd   : > { %2407 = vmatmul.msk.bf16.vlgmr.msra.gmra.mxu0 %vm785_vm0, %v1302_v42 }
 0x83a   : > { %v1331_v46 = vpop.f32.mrf.mxu0 }
 0x83b   : > { %v1332_v47 = vadd.f32 %v2631_v44, %v1331_v46  ;;  %v2581_v44 = vld [vmem:[%s3369_s27 + $0x10] sm:$0xff] }
 0x83d   : > { %v1336_v50 = vmul.f32 0.70710677, %v1332_v47  ;;  %v1335_v26 = vmul.f32 0.5, %v1332_v47 }
 0x83f   : > { %v1339_v52 = vand.u32 2147483647, %v1336_v50  ;;  %vm1337_vm10 = vcmp.ge.f32.partialorder %v1336_v50, 0.0 }
 0x840   : > { %v1338_v24 = vsel %vm1337_vm10, 1.0, %v2730_v23 }
 0x841   : > { %v1340_v53 = vmul.f32 0.3275911, %v1339_v52  ;;  %v1366_v5 = vsub.f32 0.0, %v1339_v52 }
 0x842   : > { %v1333_v54 = vpop.f32.mrf.mxu0 }
 0x843   : > { %v1341_v55 = vadd.f32 1.0, %v1340_v53  ;;  %v1367_v10 = vmul.f32 %v1366_v5, %v1339_v52 }
 0x845   : > { %2669 = vrcp.f32 %v1341_v55  ;;  %v1353_v62 = vand.u32 2147483648, %v1341_v55  ;;  %v1351_v48 = vand.u32 2147483647, %v1341_v55  ;;  %vm1347_vm4 = vweird.f32 %v1341_v55 }
 0x846   : > { %v1368_v13 = vmul.f32 1.442695, %v1367_v10 }
 0x847   : > { %v1354_v3 = vor.u32 1.1754944e-38, %v1353_v62  ;;  %vm1352_vm9 = vcmp.eq.f32.partialorder %v1351_v48, 8.507059e+37  ;;  %v2635_v62 = vld [vmem:[%s3372_s5 + $0x1] ss:$0 sm:$0xff] }
 0x848   : > { %2671 = vpow2.f32 %v1368_v13 }
 0x84b   : > { %v2670_v59 = vpop.eup %2669 }
 0x84c   : > { %v1343_v60 = vmul.f32 %v2670_v59, %v1341_v55  ;;  %vm1348_vm3 = vweird.f32 %v2670_v59  ;;  %v2633_v55 = vld [vmem:[%s3371_s3 + $0x1] ss:$0 sm:$0xff] }
 0x84d   : > { %vm1349_vm6 = vmor %vm1347_vm4, %vm1348_vm3 }
 0x84e   : > { %v1344_v58 = vsub.f32 1.0, %v1343_v60  ;;  %v2672_v21 = vpop.eup %2671 }
 0x850   : > { %v1345_v63 = vmul.f32 %v2670_v59, %v1344_v58 }
 0x852   : > { %v1346_v2 = vadd.f32 %v2670_v59, %v1345_v63 }
 0x854   : > { %v1350_v37 = vsel %vm1349_vm6, %v2670_v59, %v1346_v2  ;;  %v2634_v59 = vld [vmem:[%s3318_s10 + $0x1] ss:$0 sm:$0xff] }
 0x855   : > { %v1355_v4 = vsel %vm1352_vm9, %v1354_v3, %v1350_v37 }
 0x856   : > { %v1357_v6 = vmul.f32 1.0614054, %v1355_v4 }
 0x858   : > { %v1358_v7 = vadd.f32 -1.4531521, %v1357_v6 }
 0x85a   : > { %v1359_v11 = vmul.f32 %v1358_v7, %v1355_v4 }
 0x85c   : > { %v1360_v12 = vadd.f32 1.4214138, %v1359_v11 }
 0x85e   : > { %v1361_v15 = vmul.f32 %v1360_v12, %v1355_v4 }
 0x860   : > { %v1362_v17 = vadd.f32 -0.28449672, %v1361_v15 }
 0x862   : > { %v1363_v18 = vmul.f32 %v1362_v17, %v1355_v4 }
 0x864   : > { %v1364_v19 = vadd.f32 0.2548296, %v1363_v18 }
 0x866   : > { %v1365_v20 = vmul.f32 %v1364_v19, %v1355_v4 }
 0x868   : > { %v1370_v22 = vmul.f32 %v2672_v21, %v1365_v20 }
 0x86a   : > { %v1371_v0 = vsub.f32 1.0, %v1370_v22 }
 0x86c   : > { %v1372_v25 = vmul.f32 %v1371_v0, %v1338_v24 }
 0x86e   : > { %v1373_v27 = vadd.f32 1.0, %v1372_v25 }
 0x870   : > { %v1374_v28 = vmul.f32 %v1373_v27, %v1335_v26 }
 0x872   : > { %v1391_v29 = vpack.c.bf16 %v1374_v28, %v1374_v28 }
 0x874   : > { %1448 = vmatmul.bf16.vlgmr.msrb.gmra.mxu1 %v1391_v29 }
 0x8f1   : > { %v1449_v32 = vpop.f32.mrf.mxu1 }
 0x8f2   : > { %v1453_v34 = vadd.f32 %v1449_v32, %v3036_v14  ;;  %v2582_v14 = vld [vmem:[%s3369_s27 + $0x18] sm:$0xff] }
 0x8f3   : > { %1525 = vmatpush.bf16.msrb.mxu2 %v2582_v14 }
 0x8f4   : > { %v3091_v35 = vadd.f32 %v2632_v31, %v1453_v34 }
 0x8f6   : > { %v1463_v16 = vsel %vm785_vm0, %v3091_v35, 0.0 }
 0x8f7   : > { %1464 = vadd.xlane.f32.xlu2 %v1463_v16  ;;  %1526 = vmatpush.bf16.msrb.mxu2 %v2581_v44 }
 0x8f9   : > { %v1451_v36 = vpop.f32.mrf.mxu1 }
 0x96a   : > { %v1465_v33 = vpop.xlane.xlu2 %1464 }
 0x96b   : > { %v1466_v38 = vmul.f32 %v1465_v33, %v2881_v8 }
 0x96d   : > { %v1467_v40 = vsub.f32 %v3091_v35, %v1466_v38 }
 0x96f   : > { %v1468_v42 = vmul.f32 %v1467_v40, %v1467_v40 }
 0x971   : > { %v1469_v43 = vsel %vm785_vm0, %v1468_v42, 0.0 }
 0x972   : > { %1470 = vadd.xlane.f32.xlu0 %v1469_v43 }
 0x9e5   : > { %v1471_v45 = vpop.xlane.xlu0 %1470 }
 0x9e6   : > { %v1472_v46 = vmul.f32 %v1471_v45, %v2881_v8 }
 0x9e8   : > { %v1473_v47 = vadd.f32 1e-05, %v1472_v46 }
 0x9ea   : > { %2673 = vrsqrt.f32 %v1473_v47  ;;  %vm1480_vm12 = vweird.f32 %v1473_v47 }
 0x9f0   : > { %v2674_v49 = vpop.eup %2673 }
 0x9f1   : > { %v1475_v50 = vmul.f32 %v2674_v49, %v1473_v47  ;;  %vm1481_vm11 = vweird.f32 %v2674_v49 }
 0x9f2   : > { %vm1482_vm15 = vmor %vm1480_vm12, %vm1481_vm11 }
 0x9f3   : > { %v1476_v52 = vmul.f32 %v2674_v49, %v1475_v50 }
 0x9f5   : > { %v1477_v30 = vmul.f32 0.5, %v1476_v52 }
 0x9f7   : > { %v1478_v53 = vsub.f32 1.5, %v1477_v30 }
 0x9f9   : > { %v1479_v54 = vmul.f32 %v2674_v49, %v1478_v53 }
 0x9fb   : > { %v1483_v56 = vsel %vm1482_vm15, %v2674_v49, %v1479_v54 }
 0x9fc   : > { %v1484_v57 = vmul.f32 %v1483_v56, %v1467_v40 }
 0x9fe   : > { %v1488_v60 = vmul.f32 %v2633_v55, %v1484_v57 }
 0xa00   : > { %v1492_v61 = vadd.f32 %v2634_v59, %v1488_v60 }
 0xa02   : > { %v1498_v58 = vpack.c.bf16 %v1492_v61, %v1492_v61 }
 0xa04   : > { %2455 = vmatmul.msk.bf16.vlgmr.msrb.gmra.mxu2 %vm785_vm0, %v1498_v58 }
 0xa87   : > { %v1528_v63 = vpop.f32.mrf.mxu2 }
 0xa88   : > { %v1529_v48 = vadd.f32 %v2635_v62, %v1528_v63 }
 0xa8a   : > { %v3115_v1 = vpack.c.bf16 %v1529_v48, %v1529_v48  ;;  %v1532_v4 = vmul.f32 %v1529_v48, %v2926_v39  ;;  %v1552_v15 = vmul.f32 %v1529_v48, %v2941_v51 }
 0xa8c   : > { %1554 = vrot.lane.b32.xlu1 %v3115_v1, %s3380_s7  ;;  %2456 = vmatmul.msk.bf16.vlgmr.msra.gmra.mxu3 %vm785_vm0, %v3115_v1 }
 0xa8f   : > { %v1530_v2 = vpop.f32.mrf.mxu2 }
 0xafe   : > { %v1555_v3 = vpop.permute.xlu1 %1554 }
 0xaff   : > { %2457 = vmatmul.msk.bf16.vlgmr.msrb.gmra.mxu0 %vm785_vm0, %v1555_v3 }
 0xb0f   : > { %v1546_v37 = vpop.f32.mrf.mxu3 }
 0xb10   : > { %v1550_v5 = vmul.f32 %v1546_v37, %v2934_v41 }
 0xb12   : > { %v1551_v6 = vadd.f32 %v1550_v5, %v1532_v4 }
 0xb14   : > { %v1578_v13 = vpack.c.bf16 %v1551_v6, %v1551_v6 }
 0xb17   : > { %v1548_v7 = vpop.f32.mrf.mxu3 }
 0xb7c   : > { %v1568_v10 = vpop.f32.mrf.mxu0 }
 0xb7d   : > { %v1572_v11 = vmul.f32 %v1568_v10, %v2934_v41 }
 0xb7f   : > { %1574 = vrot.lane.b32.xlu2 %v1572_v11, %s3381_s26  ;;  %s3389_s26 = smov 40  }
 0xb84   : > { %v1570_v12 = vpop.f32.mrf.mxu0 }
 0xb87   : > { %1650 = vrot.lane.b32.xlu2 %v1578_v13, %s3382_s8  ;;  %s3390_s8 = smov 48  }
 0xb8f   : > { %1790 = vrot.lane.b32.xlu2 %v1578_v13, %s3383_s4  ;;  %s3391_s4 = smov 56  }
 0xbd9   : > { %v1575_v17 = vpop.permute.xlu2 %1574 }
 0xbda   : > { %v1577_v18 = vadd.f32 %v1575_v17, %v1552_v15 }
 0xbdc   : > { %v1579_v39 = vpack.c.bf16 %v1577_v18, %v1577_v18 }
 0xbde   : > { %1652 = vrot.lane.b32.xlu1 %v1579_v39, %s3384_s0  ;;  %1581 = vrot.lane.b32.xlu0 %v1579_v39, %s3380_s7  ;;  %s3388_s7 = smov 64   ;;  %s3392_s0 = smov 16  }
 0xbe1   : > { %v1651_v51 = vpop.permute.xlu2 %1650 }
 0xbe6   : > { %1722 = vrot.lane.b32.xlu0 %v1579_v39, %s3385_s30  ;;  %1720 = vrot.lane.b32.xlu1 %v1578_v13, %s3386_s1  ;;  %s3393_s30 = smov 8   ;;  %s3394_s1 = smov 24  }
 0xbe9   : > { %v1791_v26 = vpop.permute.xlu2 %1790 }
 0xbee   : > { %1792 = vrot.lane.b32.xlu0 %v1579_v39, %s3387_s9 }
 0xc50   : > { %v1653_v41 = vpop.permute.xlu1 %1652  ;;  %v1582_v19 = vpop.permute.xlu0 %1581 }
 0xc51   : > { %v1658_v20 = vsel %vm927_vm5, %v1653_v41, 0  ;;  %v1587_v21 = vsel %vm927_vm5, %v1582_v19, 0 }
 0xc52   : > { %1596 = vmatpush.bf16.xpose.msra.mxu2 %v1587_v21  ;;  %1667 = vmatpush.bf16.xpose.msra.mxu0 %v1658_v20 }
 0xc58   : > { %v1723_v22 = vpop.permute.xlu0 %1722  ;;  %v1721_v27 = vpop.permute.xlu1 %1720 }
 0xc59   : > { %v1728_v0 = vsel %vm927_vm5, %v1723_v22, 0  ;;  %2458 = vmatmul.msk.bf16.vlgmr.msra.gmra.mxu2 %vm927_vm5, %v1578_v13  ;;  %2460 = vmatmul.msk.bf16.vlgmr.msra.gmra.mxu0 %vm927_vm5, %v1651_v51 }
 0xc5a   : > { %1737 = vmatpush.bf16.xpose.msrb.mxu2 %v1728_v0 }
 0xc60   : > { %v1793_v24 = vpop.permute.xlu0 %1792 }
 0xc61   : > { %v1798_v25 = vsel %vm927_vm5, %v1793_v24, 0 }
 0xc62   : > { %1807 = vmatpush.bf16.xpose.msrb.mxu0 %v1798_v25 }
 0xc69   : > { %2462 = vmatmul.msk.bf16.vlgmr.msrb.gmra.mxu2 %vm927_vm5, %v1721_v27  ;;  %2464 = vmatmul.msk.bf16.vlgmr.msrb.gmra.mxu0 %vm927_vm5, %v1791_v26 }
 0xcd6   : > { %v1669_v28 = vpop.f32.mrf.mxu0 }
 0xcd7   : > { %v1673_v29 = vsel %vm2962_vm7, -1e+30, %v1669_v28 }
 0xcd8   : > { %v1674_v31 = vsel %vm927_vm5, %v1673_v29, -inf }
 0xcd9   : > { %1675 = vmax.xlane.f32.xlu0 %v1674_v31 }
 0xcdc   : > { %v1598_v32 = vpop.f32.mrf.mxu2 }
 0xcdd   : > { %v1602_v34 = vsel %vm2962_vm7, -1e+30, %v1598_v32 }
 0xcde   : > { %v1671_v16 = vpop.f32.mrf.mxu0  ;;  %v1603_v36 = vsel %vm927_vm5, %v1602_v34, -inf }
 0xcdf   : > { %1604 = vmax.xlane.f32.xlu1 %v1603_v36 }
 0xce4   : > { %v1600_v33 = vpop.f32.mrf.mxu2 }
 0xce6   : > { %v1809_v38 = vpop.f32.mrf.mxu0 }
 0xce7   : > { %v1813_v40 = vsel %vm2962_vm7, -1e+30, %v1809_v38 }
 0xce8   : > { %v1814_v42 = vsel %vm927_vm5, %v1813_v40, -inf }
 0xce9   : > { %1815 = vmax.xlane.f32.xlu1 %v1814_v42 }
 0xcec   : > { %v1739_v43 = vpop.f32.mrf.mxu2 }
 0xced   : > { %v1743_v14 = vsel %vm2962_vm7, -1e+30, %v1739_v43  ;;  %1628 = vrot.lane.b32.xlu0 %v3115_v1, %s3388_s7 }
 0xcee   : > { %v1811_v44 = vpop.f32.mrf.mxu0  ;;  %v1744_v45 = vsel %vm927_vm5, %v1743_v14, -inf }
 0xcef   : > { %1745 = vmax.xlane.f32.xlu2 %v1744_v45 }
 0xcf4   : > { %v1741_v46 = vpop.f32.mrf.mxu2 }
 0xd4c   : > { %v1676_v47 = vpop.xlane.xlu0 %1675 }
 0xd4d   : > { %v1677_v49 = vsub.f32 %v1673_v29, %v1676_v47 }
 0xd4f   : > { %v1678_v50 = vmul.f32 1.442695, %v1677_v49 }
 0xd51   : > { %2675 = vpow2.f32 %v1678_v50 }
 0xd52   : > { %v1605_v52 = vpop.xlane.xlu1 %1604 }
 0xd53   : > { %v1606_v30 = vsub.f32 %v1602_v34, %v1605_v52 }
 0xd55   : > { %v1607_v53 = vmul.f32 1.442695, %v1606_v30 }
 0xd57   : > { %v3156_v54 = vpop.eup %2675  ;;  %2677 = vpow2.f32 %v1607_v53 }
 0xd58   : > { %v1680_v9 = vsel %vm927_vm5, %v3156_v54, 0.0 }
 0xd59   : > { %1681 = vadd.xlane.f32.xlu2 %v1680_v9 }
 0xd5c   : > { %v1816_v55 = vpop.xlane.xlu1 %1815 }
 0xd5d   : > { %v2678_v56 = vpop.eup %2677  ;;  %v1817_v57 = vsub.f32 %v1813_v40, %v1816_v55 }
 0xd5e   : > { %v1609_v59 = vsel %vm927_vm5, %v2678_v56, 0.0 }
 0xd5f   : > { %v1818_v60 = vmul.f32 1.442695, %v1817_v57  ;;  %v1629_v61 = vpop.permute.xlu0 %1628  ;;  %1610 = vadd.xlane.f32.xlu0 %v1609_v59 }
 0xd60   : > { %v1634_v58 = vsel %vm982_vm8, %v1629_v61, 0 }
 0xd61   : > { %2679 = vpow2.f32 %v1818_v60  ;;  %1643 = vmatpush.bf16.msrb.mxu3 %v1634_v58 }
 0xd62   : > { %v1746_v62 = vpop.xlane.xlu2 %1745 }
 0xd63   : > { %v1747_v63 = vsub.f32 %v1743_v14, %v1746_v62 }
 0xd65   : > { %v1748_v48 = vmul.f32 1.442695, %v1747_v63 }
 0xd67   : > { %v3162_v2 = vpop.eup %2679  ;;  %2681 = vpow2.f32 %v1748_v48 }
 0xd68   : > { %v1820_v3 = vsel %vm927_vm5, %v3162_v2, 0.0 }
 0xd69   : > { %1821 = vadd.xlane.f32.xlu2 %v1820_v3 }
 0xd6d   : > { %v2682_v37 = vpop.eup %2681 }
 0xd6e   : > { %v1750_v4 = vsel %vm927_vm5, %v2682_v37, 0.0 }
 0xd6f   : > { %1751 = vadd.xlane.f32.xlu1 %v1750_v4 }
 0xd73   : > { %1839 = vrot.lane.b32.xlu0 %v3115_v1, %s3389_s26 }
 0xd81   : > { %1769 = vrot.lane.b32.xlu2 %v3115_v1, %s3390_s8 }
 0xd88   : > { %1699 = vrot.lane.b32.xlu1 %v3115_v1, %s3391_s4 }
 0xdcc   : > { %v1682_v6 = vpop.xlane.xlu2 %1681 }
 0xdcd   : > { %v1694_v33 = vand.u32 2147483648, %v1682_v6  ;;  %vm1688_vm10 = vweird.f32 %v1682_v6  ;;  %v1692_v40 = vand.u32 2147483647, %v1682_v6 }
 0xdcf   : > { %v1695_v46 = vor.u32 1.1754944e-38, %v1694_v33 }
 0xdd2   : > { %v1611_v5 = vpop.xlane.xlu0 %1610 }
 0xdd3   : > { %2683 = vrcp.f32 %v1611_v5  ;;  %v1623_v13 = vand.u32 2147483648, %v1611_v5  ;;  %v1621_v17 = vand.u32 2147483647, %v1611_v5  ;;  %vm1617_vm1 = vweird.f32 %v1611_v5 }
 0xdd4   : > { %2685 = vrcp.f32 %v1682_v6 }
 0xdd5   : > { %v1624_v41 = vor.u32 1.1754944e-38, %v1623_v13  ;;  %vm1622_vm3 = vcmp.eq.f32.partialorder %v1621_v17, 8.507059e+37  ;;  %v2583_v13 = vld [vmem:[%s3378_s28 + $0x10] sm:$0xff] }
 0xdd9   : > { %v2684_v7 = vpop.eup %2683 }
 0xdda   : > { %v1613_v10 = vmul.f32 %v2684_v7, %v1611_v5  ;;  %vm1618_vm7 = vweird.f32 %v2684_v7  ;;  %v2686_v18 = vpop.eup %2685 }
 0xddb   : > { %vm1619_vm2 = vmor %vm1617_vm1, %vm1618_vm7  ;;  %v1684_v20 = vmul.f32 %v2686_v18, %v1682_v6  ;;  %vm1689_vm6 = vweird.f32 %v2686_v18  ;;  %vm1693_vm7 = vcmp.eq.f32.partialorder %v1692_v40, 8.507059e+37 }
 0xddc   : > { %v1614_v11 = vsub.f32 1.0, %v1613_v10  ;;  %v3173_v12 = vpop.xlane.xlu2 %1821  ;;  %vm1690_vm12 = vmor %vm1688_vm10, %vm1689_vm6 }
 0xddd   : > { %v1685_v25 = vsub.f32 1.0, %v1684_v20  ;;  %v1834_v61 = vand.u32 2147483648, %v3173_v12  ;;  %v2636_v20 = vld [vmem:[%s3379_s6 + $0x1] ss:$0 sm:$0xff] }
 0xdde   : > { %v1615_v15 = vmul.f32 %v2684_v7, %v1614_v11 }
 0xddf   : > { %v1686_v28 = vmul.f32 %v2686_v18, %v1685_v25  ;;  %v1835_v62 = vor.u32 1.1754944e-38, %v1834_v61 }
 0xde0   : > { %v1616_v39 = vadd.f32 %v2684_v7, %v1615_v15 }
 0xde1   : > { %v1687_v16 = vadd.f32 %v2686_v18, %v1686_v28 }
 0xde2   : > { %v1620_v19 = vsel %vm1619_vm2, %v2684_v7, %v1616_v39  ;;  %v1752_v1 = vpop.xlane.xlu1 %1751  ;;  %vm1828_vm2 = vweird.f32 %v3173_v12 }
 0xde3   : > { %v1625_v21 = vsel %vm1622_vm3, %v1624_v41, %v1620_v19  ;;  %2687 = vrcp.f32 %v1752_v1  ;;  %v1764_v31 = vand.u32 2147483648, %v1752_v1  ;;  %v1762_v34 = vand.u32 2147483647, %v1752_v1 }
 0xde4   : > { %v1626_v51 = vmul.f32 %v2678_v56, %v1625_v21  ;;  %v1770_v22 = vpop.permute.xlu2 %1769  ;;  %2689 = vrcp.f32 %v3173_v12  ;;  %vm1758_vm9 = vweird.f32 %v1752_v1  ;;  %v1691_v14 = vsel %vm1690_vm12, %v2686_v18, %v1687_v16 }
 0xde5   : > { %v1775_v0 = vsel %vm982_vm8, %v1770_v22, 0  ;;  %v1765_v42 = vor.u32 1.1754944e-38, %v1764_v31  ;;  %vm1763_vm15 = vcmp.eq.f32.partialorder %v1762_v34, 8.507059e+37  ;;  %v1696_v49 = vsel %vm1693_vm7, %v1695_v46, %v1691_v14  ;;  %v1840_v53 = vpop.permute.xlu0 %1839  ;;  %v2585_v31 = vld [vmem:[%s3321_s13 + $0x10] sm:$0xff]  ;;  %v2637_v14 = vld [vmem:[%s3319_s11 + $0x1] ss:$0 sm:$0xff] }
 0xde6   : > { %1784 = vmatpush.bf16.msra.mxu3 %v1775_v0  ;;  %v1627_v24 = vpack.c.bf16 %v1626_v51, %v1626_v51  ;;  %v1697_v30 = vmul.f32 %v3156_v54, %v1696_v49  ;;  %v1845_v57 = vsel %vm982_vm8, %v1840_v53, 0  ;;  %v1832_v54 = vand.u32 2147483647, %v3173_v12  ;;  %v2638_v46 = vld [vmem:[%s3320_s12 + $0x1] ss:$0 sm:$0xff]  ;;  %v2593_v53 = vld [vmem:[%s3323_s15 + $0x70] sm:$0xff] }
 0xde8   : > { %2459 = vmatmul.msk.bf16.vlgmr.msrb.gmra.mxu3 %vm927_vm5, %v1627_v24  ;;  %v1698_v59 = vpack.c.bf16 %v1697_v30, %v1697_v30  ;;  %v2639_v30 = vld [vmem:[%s3322_s14 + $0x1] ss:$0 sm:$0xff] }
 0xde9   : > { %v2688_v26 = vpop.eup %2687 }
 0xdea   : > { %v1754_v27 = vmul.f32 %v2688_v26, %v1752_v1  ;;  %vm1759_vm4 = vweird.f32 %v2688_v26  ;;  %v2690_v36 = vpop.eup %2689 }
 0xdeb   : > { %vm1760_vm11 = vmor %vm1758_vm9, %vm1759_vm4  ;;  %v1824_v44 = vmul.f32 %v2690_v36, %v3173_v12  ;;  %vm1829_vm1 = vweird.f32 %v2690_v36  ;;  %vm1833_vm4 = vcmp.eq.f32.partialorder %v1832_v54, 8.507059e+37 }
 0xdec   : > { %v1755_v29 = vsub.f32 1.0, %v1754_v27  ;;  %vm1830_vm3 = vmor %vm1828_vm2, %vm1829_vm1 }
 0xded   : > { %v1825_v52 = vsub.f32 1.0, %v1824_v44 }
 0xdee   : > { %v1756_v32 = vmul.f32 %v2688_v26, %v1755_v29 }
 0xdef   : > { %v1826_v55 = vmul.f32 %v2690_v36, %v1825_v52  ;;  %v2594_v52 = vld [vmem:[%s3323_s15 + $0x78] sm:$0xff] }
 0xdf0   : > { %v1757_v38 = vadd.f32 %v2688_v26, %v1756_v32  ;;  %2095 = vmatpush.bf16.msra.mxu0 %v2594_v52 }
 0xdf1   : > { %v1827_v60 = vadd.f32 %v2690_v36, %v1826_v55 }
 0xdf2   : > { %v1761_v43 = vsel %vm1760_vm11, %v2688_v26, %v1757_v38 }
 0xdf3   : > { %v1766_v45 = vsel %vm1763_vm15, %v1765_v42, %v1761_v43  ;;  %v1831_v58 = vsel %vm1830_vm3, %v2690_v36, %v1827_v60  ;;  %v2591_v60 = vld [vmem:[%s3323_s15 + $0x60] sm:$0xff] }
 0xdf4   : > { %v1767_v47 = vmul.f32 %v2682_v37, %v1766_v45  ;;  %v1836_v63 = vsel %vm1833_vm4, %v1835_v62, %v1831_v58  ;;  %2096 = vmatpush.bf16.msra.mxu0 %v2593_v53  ;;  %v2590_v62 = vld [vmem:[%s3323_s15 + $0x58] sm:$0xff] }
 0xdf5   : > { %v1837_v48 = vmul.f32 %v3162_v2, %v1836_v63  ;;  %v2584_v2 = vld [vmem:[%s3378_s28 + $0x18] sm:$0xff]  ;;  %v2589_v63 = vld [vmem:[%s3323_s15 + $0x50] sm:$0xff] }
 0xdf6   : > { %v1768_v50 = vpack.c.bf16 %v1767_v47, %v1767_v47  ;;  %1902 = vmatpush.bf16.msra.mxu2 %v2584_v2 }
 0xdf7   : > { %v1838_v3 = vpack.c.bf16 %v1837_v48, %v1837_v48 }
 0xdf8   : > { %2463 = vmatmul.msk.bf16.vlgmr.msra.gmra.mxu3 %vm927_vm5, %v1768_v50 }
 0xdfa   : > { %v1700_v9 = vpop.permute.xlu1 %1699  ;;  %1903 = vmatpush.bf16.msra.mxu2 %v2583_v13 }
 0xdfb   : > { %v1705_v56 = vsel %vm982_vm8, %v1700_v9, 0 }
 0xdfc   : > { %1714 = vmatpush.bf16.msra.mxu1 %v1705_v56  ;;  %v2592_v56 = vld [vmem:[%s3323_s15 + $0x68] sm:$0xff] }
 0xdfd   : > { %2097 = vmatpush.bf16.msra.mxu0 %v2592_v56 }
 0xdff   : > { %2461 = vmatmul.msk.bf16.vlgmr.msra.gmra.mxu1 %vm927_vm5, %v1698_v59 }
 0xe00   : > { %1854 = vmatpush.bf16.msrb.mxu1 %v1845_v57 }
 0xe01   : > { %2098 = vmatpush.bf16.msra.mxu0 %v2591_v60 }
 0xe05   : > { %2099 = vmatpush.bf16.msra.mxu0 %v2590_v62 }
 0xe09   : > { %2100 = vmatpush.bf16.msra.mxu0 %v2589_v63 }
 0xe0f   : > { %2465 = vmatmul.msk.bf16.vlgmr.msrb.gmra.mxu1 %vm927_vm5, %v1838_v3 }
 0xe6b   : > { %v1645_v37 = vpop.f32.mrf.mxu3 }
 0xe73   : > { %v1647_v4 = vpop.f32.mrf.mxu3 }
 0xe7b   : > { %v1786_v5 = vpop.f32.mrf.mxu3 }
 0xe7c   : > { %v1716_v6 = vpop.f32.mrf.mxu1  ;;  %1865 = vrot.lane.b32.xlu1 %v1786_v5, %s3392_s0 }
 0xe7d   : > { %1861 = vrot.lane.b32.xlu0 %v1716_v6, %s3393_s30  ;;  %s3395_s30 = sshll.u32 %s3397_s2, 3 }
 0xe7e   : > { %s773_s7 = scalar_lea.vmem %s3333_s25, %s3395_s30 }
 0xe83   : > { %v1788_v7 = vpop.f32.mrf.mxu3 }
 0xe84   : > { %v1718_v10 = vpop.f32.mrf.mxu1 }
 0xe85   : > { %v2587_v10 = vld [vmem:[%s3323_s15 + $0x40] sm:$0xff] }
 0xe8c   : > { %v1856_v11 = vpop.f32.mrf.mxu1 }
 0xe8d   : > { %1869 = vrot.lane.b32.xlu2 %v1856_v11, %s3394_s1 }
 0xe94   : > { %v1858_v12 = vpop.f32.mrf.mxu1 }
 0xee7   : > { %v1870_v39 = vpop.permute.xlu2 %1869 }
 0xeee   : > { %v1866_v17 = vpop.permute.xlu1 %1865 }
 0xeef   : > { %v1862_v15 = vpop.permute.xlu0 %1861 }
 0xef0   : > { %v1872_v18 = vsel %vm927_vm5, %v1645_v37, %v1862_v15  ;;  %v2588_v37 = vld [vmem:[%s3323_s15 + $0x48] sm:$0xff] }
 0xef1   : > { %v1873_v41 = vsel %vm1223_vm13, %v1872_v18, %v1866_v17  ;;  %2101 = vmatpush.bf16.msra.mxu0 %v2588_v37 }
 0xef2   : > { %v1874_v19 = vsel %vm1225_vm14, %v1873_v41, %v1870_v39 }
 0xef3   : > { %v1880_v1 = vpack.c.bf16 %v1874_v19, %v1874_v19 }
 0xef5   : > { %2478 = vmatmul.msk.bf16.vlgmr.msra.gmra.mxu2 %vm785_vm0, %v1880_v1  ;;  %2102 = vmatpush.bf16.msra.mxu0 %v2587_v10 }
 0xf78   : > { %v1905_v21 = vpop.f32.mrf.mxu2 }
 0xf79   : > { %v1909_v51 = vadd.f32 %v1905_v21, %v3091_v35  ;;  %v2586_v35 = vld [vmem:[%s3321_s13 + $0x18] sm:$0xff] }
 0xf7a   : > { %1982 = vmatpush.bf16.msrb.mxu3 %v2586_v35 }
 0xf7b   : > { %v3206_v22 = vadd.f32 %v2636_v20, %v1909_v51 }
 0xf7d   : > { %v1920_v0 = vsel %vm785_vm0, %v3206_v22, 0.0 }
 0xf7e   : > { %1921 = vadd.xlane.f32.xlu0 %v1920_v0  ;;  %1983 = vmatpush.bf16.msrb.mxu3 %v2585_v31 }
 0xf80   : > { %v1907_v24 = vpop.f32.mrf.mxu2 }
 0xff1   : > { %v1922_v25 = vpop.xlane.xlu0 %1921 }
 0xff2   : > { %v1923_v26 = vmul.f32 %v1922_v25, %v2881_v8 }
 0xff4   : > { %v1924_v27 = vsub.f32 %v3206_v22, %v1923_v26 }
 0xff6   : > { %v1925_v28 = vmul.f32 %v1924_v27, %v1924_v27 }
 0xff8   : > { %v1926_v29 = vsel %vm785_vm0, %v1925_v28, 0.0 }
 0xff9   : > { %1927 = vadd.xlane.f32.xlu1 %v1926_v29 }
0x106c   : > { %v1928_v32 = vpop.xlane.xlu1 %1927 }
0x106d   : > { %v1929_v34 = vmul.f32 %v1928_v32, %v2881_v8 }
0x106f   : > { %v1930_v16 = vadd.f32 1e-05, %v1929_v34 }
0x1071   : > { %2691 = vrsqrt.f32 %v1930_v16  ;;  %vm1937_vm8 = vweird.f32 %v1930_v16 }
0x1077   : > { %v2692_v36 = vpop.eup %2691 }
0x1078   : > { %v1932_v33 = vmul.f32 %v2692_v36, %v1930_v16  ;;  %vm1938_vm5 = vweird.f32 %v2692_v36  ;;  %v2640_v16 = vld [vmem:[%s3324_s16 + $0x1] ss:$0 sm:$0xff] }
0x1079   : > { %vm1939_vm13 = vmor %vm1937_vm8, %vm1938_vm5 }
0x107a   : > { %v1933_v38 = vmul.f32 %v2692_v36, %v1932_v33 }
0x107c   : > { %v1934_v40 = vmul.f32 0.5, %v1933_v38 }
0x107e   : > { %v1935_v42 = vsub.f32 1.5, %v1934_v40 }
0x1080   : > { %v1936_v43 = vmul.f32 %v2692_v36, %v1935_v42 }
0x1082   : > { %v1940_v44 = vsel %vm1939_vm13, %v2692_v36, %v1936_v43 }
0x1083   : > { %v1941_v45 = vmul.f32 %v1940_v44, %v1924_v27 }
0x1085   : > { %v1945_v47 = vmul.f32 %v2637_v14, %v1941_v45 }
0x1087   : > { %v1949_v49 = vadd.f32 %v2638_v46, %v1945_v47  ;;  %v2596_v47 = vld [vmem:[%s3327_s19 + $0x8] sm:$0xff] }
0x1088   : > { %2177 = vmatpush.bf16.msra.mxu1 %v2596_v47  ;;  %v2598_v47 = vld [vmem:[%s3331_s23 + $0x8] sm:$0xff] }
0x1089   : > { %v1955_v50 = vpack.c.bf16 %v1949_v49, %v1949_v49  ;;  %2286 = vmatpush.bf16.msrb.mxu2 %v2598_v47 }
0x108b   : > { %2495 = vmatmul.msk.bf16.vlgmr.msrb.gmra.mxu3 %vm785_vm0, %v1955_v50 }
0x110e   : > { %v1985_v9 = vpop.f32.mrf.mxu3 }
0x110f   : > { %v1986_v55 = vadd.f32 %v2639_v30, %v1985_v9 }
0x1111   : > { %v1990_v57 = vmul.f32 0.70710677, %v1986_v55  ;;  %v1989_v35 = vmul.f32 0.5, %v1986_v55 }
0x1113   : > { %v1993_v59 = vand.u32 2147483647, %v1990_v57  ;;  %vm1991_vm11 = vcmp.ge.f32.partialorder %v1990_v57, 0.0 }
0x1114   : > { %v1992_v28 = vsel %vm1991_vm11, 1.0, %v2730_v23 }
0x1115   : > { %v1994_v61 = vmul.f32 0.3275911, %v1993_v59  ;;  %v2020_v15 = vsub.f32 0.0, %v1993_v59 }
0x1116   : > { %v1987_v54 = vpop.f32.mrf.mxu3 }
0x1117   : > { %v1995_v58 = vadd.f32 1.0, %v1994_v61  ;;  %v2021_v39 = vmul.f32 %v2020_v15, %v1993_v59  ;;  %v2641_v59 = vld [vmem:[%s3325_s17] ss:$0 sm:$0xff] }
0x1118   : > { %v2642_v54 = vld [vmem:[%s3326_s18] ss:$0 sm:$0xff] }
0x1119   : > { %2693 = vrcp.f32 %v1995_v58  ;;  %v2007_v5 = vand.u32 2147483648, %v1995_v58  ;;  %v2005_v7 = vand.u32 2147483647, %v1995_v58  ;;  %vm2001_vm6 = vweird.f32 %v1995_v58 }
0x111a   : > { %v2022_v1 = vmul.f32 1.442695, %v2021_v39 }
0x111b   : > { %v2008_v12 = vor.u32 1.1754944e-38, %v2007_v5  ;;  %vm2006_vm10 = vcmp.eq.f32.partialorder %v2005_v7, 8.507059e+37 }
0x111c   : > { %2695 = vpow2.f32 %v2022_v1 }
0x111f   : > { %v2694_v48 = vpop.eup %2693 }
0x1120   : > { %v1997_v3 = vmul.f32 %v2694_v48, %v1995_v58  ;;  %vm2002_vm14 = vweird.f32 %v2694_v48 }
0x1121   : > { %vm2003_vm9 = vmor %vm2001_vm6, %vm2002_vm14 }
0x1122   : > { %v1998_v4 = vsub.f32 1.0, %v1997_v3  ;;  %v2696_v25 = vpop.eup %2695 }
0x1124   : > { %v1999_v6 = vmul.f32 %v2694_v48, %v1998_v4 }
0x1126   : > { %v2000_v11 = vadd.f32 %v2694_v48, %v1999_v6 }
0x1128   : > { %v2004_v2 = vsel %vm2003_vm9, %v2694_v48, %v2000_v11  ;;  %v2643_v48 = vld [vmem:[%s3328_s20] ss:$0 sm:$0xff] }
0x1129   : > { %v2009_v13 = vsel %vm2006_vm10, %v2008_v12, %v2004_v2 }
0x112a   : > { %v2011_v17 = vmul.f32 1.0614054, %v2009_v13 }
0x112c   : > { %v2012_v18 = vadd.f32 -1.4531521, %v2011_v17 }
0x112e   : > { %v2013_v41 = vmul.f32 %v2012_v18, %v2009_v13 }
0x1130   : > { %v2014_v19 = vadd.f32 1.4214138, %v2013_v41 }
0x1132   : > { %v2015_v20 = vmul.f32 %v2014_v19, %v2009_v13 }
0x1134   : > { %v2016_v21 = vadd.f32 -0.28449672, %v2015_v20 }
0x1136   : > { %v2017_v51 = vmul.f32 %v2016_v21, %v2009_v13 }
0x1138   : > { %v2018_v0 = vadd.f32 0.2548296, %v2017_v51 }
0x113a   : > { %v2019_v24 = vmul.f32 %v2018_v0, %v2009_v13 }
0x113c   : > { %v2024_v26 = vmul.f32 %v2696_v25, %v2019_v24 }
0x113e   : > { %v2025_v27 = vsub.f32 1.0, %v2024_v26 }
0x1140   : > { %v2026_v29 = vmul.f32 %v2025_v27, %v1992_v28 }
0x1142   : > { %v2027_v31 = vadd.f32 1.0, %v2026_v29 }
0x1144   : > { %v2028_v32 = vmul.f32 %v2027_v31, %v1989_v35 }
0x1146   : > { %v2046_v34 = vpack.c.bf16 %v2028_v32, %v2028_v32 }
0x1148   : > { %2103 = vmatmul.bf16.vlgmr.msra.gmra.mxu0 %v2046_v34 }
0x11c5   : > { %v2104_v36 = vpop.f32.mrf.mxu0 }
0x11c6   : > { %v2108_v33 = vadd.f32 %v2104_v36, %v3206_v22  ;;  %v2595_v22 = vld [vmem:[%s3327_s19] sm:$0xff] }
0x11c7   : > { %2178 = vmatpush.bf16.msra.mxu1 %v2595_v22 }
0x11c8   : > { %v2114_v38 = vadd.f32 %v2640_v16, %v2108_v33 }
0x11ca   : > { %v2117_v40 = vsel %vm785_vm0, %v2114_v38, 0.0 }
0x11cb   : > { %2118 = vadd.xlane.f32.xlu2 %v2117_v40 }
0x11cd   : > { %v2106_v42 = vpop.f32.mrf.mxu0 }
0x123e   : > { %v2119_v43 = vpop.xlane.xlu2 %2118 }
0x123f   : > { %v2120_v14 = vmul.f32 %v2119_v43, %v2881_v8 }
0x1241   : > { %v2121_v44 = vsub.f32 %v2114_v38, %v2120_v14 }
0x1243   : > { %v2122_v45 = vmul.f32 %v2121_v44, %v2121_v44 }
0x1245   : > { %v2123_v46 = vsel %vm785_vm0, %v2122_v45, 0.0 }
0x1246   : > { %2124 = vadd.xlane.f32.xlu0 %v2123_v46 }
0x12b9   : > { %v2125_v49 = vpop.xlane.xlu0 %2124 }
0x12ba   : > { %v2126_v50 = vmul.f32 %v2125_v49, %v2881_v8 }
0x12bc   : > { %v2127_v52 = vadd.f32 1e-05, %v2126_v50 }
0x12be   : > { %2697 = vrsqrt.f32 %v2127_v52  ;;  %vm2134_vm15 = vweird.f32 %v2127_v52 }
0x12c4   : > { %v2698_v30 = vpop.eup %2697 }
0x12c5   : > { %v2129_v53 = vmul.f32 %v2698_v30, %v2127_v52  ;;  %vm2135_vm12 = vweird.f32 %v2698_v30 }
0x12c6   : > { %vm2136_vm7 = vmor %vm2134_vm15, %vm2135_vm12 }
0x12c7   : > { %v2130_v9 = vmul.f32 %v2698_v30, %v2129_v53 }
0x12c9   : > { %v2131_v55 = vmul.f32 0.5, %v2130_v9 }
0x12cb   : > { %v2132_v56 = vsub.f32 1.5, %v2131_v55 }
0x12cd   : > { %v2133_v57 = vmul.f32 %v2698_v30, %v2132_v56 }
0x12cf   : > { %v2137_v60 = vsel %vm2136_vm7, %v2698_v30, %v2133_v57  ;;  %v2644_v57 = vld [vmem:[%s3329_s21] ss:$0 sm:$0xff] }
0x12d0   : > { %v2138_v61 = vmul.f32 %v2137_v60, %v2121_v44 }
0x12d2   : > { %v2142_v58 = vmul.f32 %v2641_v59, %v2138_v61 }
0x12d4   : > { %v2146_v62 = vadd.f32 %v2642_v54, %v2142_v58 }
0x12d6   : > { %v2151_v63 = vpack.c.bf16 %v2146_v62, %v2146_v62  ;;  %v2646_v62 = vld [vmem:[%s3332_s24] ss:$0 sm:$0xff] }
0x12d8   : > { %2553 = vmatmul.msk.bf16.vlgmr.msra.gmra.mxu1 %vm785_vm0, %v2151_v63 }
0x1355   : > { %v2180_v3 = vpop.f32.mrf.mxu1 }
0x1356   : > { %v2181_v37 = vadd.f32 %v2643_v48, %v2180_v3 }
0x1358   : > { %v2185_v4 = vmul.f32 0.70710677, %v2181_v37  ;;  %v2184_v33 = vmul.f32 0.5, %v2181_v37 }
0x135a   : > { %v2188_v5 = vand.u32 2147483647, %v2185_v4  ;;  %vm2186_vm5 = vcmp.ge.f32.partialorder %v2185_v4, 0.0 }
0x135b   : > { %v2187_v16 = vsel %vm2186_vm5, 1.0, %v2730_v23  ;;  %v2597_v23 = vld [vmem:[%s3331_s23] sm:$0xff] }
0x135c   : > { %v2189_v6 = vmul.f32 0.3275911, %v2188_v5  ;;  %v2215_v19 = vsub.f32 0.0, %v2188_v5  ;;  %2287 = vmatpush.bf16.msrb.mxu2 %v2597_v23 }
0x135d   : > { %v2182_v7 = vpop.f32.mrf.mxu1 }
0x135e   : > { %v2190_v10 = vadd.f32 1.0, %v2189_v6  ;;  %v2216_v51 = vmul.f32 %v2215_v19, %v2188_v5 }
0x1360   : > { %2699 = vrcp.f32 %v2190_v10  ;;  %v2202_v13 = vand.u32 2147483648, %v2190_v10  ;;  %v2200_v17 = vand.u32 2147483647, %v2190_v10  ;;  %vm2196_vm2 = vweird.f32 %v2190_v10 }
0x1361   : > { %v2217_v25 = vmul.f32 1.442695, %v2216_v51 }
0x1362   : > { %v2203_v39 = vor.u32 1.1754944e-38, %v2202_v13  ;;  %vm2201_vm4 = vcmp.eq.f32.partialorder %v2200_v17, 8.507059e+37 }
0x1363   : > { %2701 = vpow2.f32 %v2217_v25 }
0x1366   : > { %v2700_v11 = vpop.eup %2699 }
0x1367   : > { %v2192_v12 = vmul.f32 %v2700_v11, %v2190_v10  ;;  %vm2197_vm1 = vweird.f32 %v2700_v11 }
0x1368   : > { %vm2198_vm3 = vmor %vm2196_vm2, %vm2197_vm1 }
0x1369   : > { %v2193_v2 = vsub.f32 1.0, %v2192_v12  ;;  %v2702_v31 = vpop.eup %2701 }
0x136b   : > { %v2194_v15 = vmul.f32 %v2700_v11, %v2193_v2 }
0x136d   : > { %v2195_v18 = vadd.f32 %v2700_v11, %v2194_v15 }
0x136f   : > { %v2199_v41 = vsel %vm2198_vm3, %v2700_v11, %v2195_v18 }
0x1370   : > { %v2204_v1 = vsel %vm2201_vm4, %v2203_v39, %v2199_v41 }
0x1371   : > { %v2206_v20 = vmul.f32 1.0614054, %v2204_v1 }
0x1373   : > { %v2207_v21 = vadd.f32 -1.4531521, %v2206_v20 }
0x1375   : > { %v2208_v0 = vmul.f32 %v2207_v21, %v2204_v1 }
0x1377   : > { %v2209_v24 = vadd.f32 1.4214138, %v2208_v0 }
0x1379   : > { %v2210_v26 = vmul.f32 %v2209_v24, %v2204_v1 }
0x137b   : > { %v2211_v27 = vadd.f32 -0.28449672, %v2210_v26 }
0x137d   : > { %v2212_v28 = vmul.f32 %v2211_v27, %v2204_v1 }
0x137f   : > { %v2213_v29 = vadd.f32 0.2548296, %v2212_v28 }
0x1381   : > { %v2214_v35 = vmul.f32 %v2213_v29, %v2204_v1 }
0x1383   : > { %v2219_v32 = vmul.f32 %v2702_v31, %v2214_v35 }
0x1385   : > { %v2220_v34 = vsub.f32 1.0, %v2219_v32 }
0x1387   : > { %v2221_v36 = vmul.f32 %v2220_v34, %v2187_v16 }
0x1389   : > { %v2222_v38 = vadd.f32 1.0, %v2221_v36 }
0x138b   : > { %v2223_v40 = vmul.f32 %v2222_v38, %v2184_v33 }
0x138d   : > { %v2226_v42 = vsel %vm785_vm0, %v2223_v40, 0.0 }
0x138e   : > { %2227 = vadd.xlane.f32.xlu1 %v2226_v42 }
0x1401   : > { %v2228_v43 = vpop.xlane.xlu1 %2227 }
0x1402   : > { %v2229_v14 = vmul.f32 %v2228_v43, %v2881_v8 }
0x1404   : > { %v2230_v44 = vsub.f32 %v2223_v40, %v2229_v14 }
0x1406   : > { %v2231_v45 = vmul.f32 %v2230_v44, %v2230_v44 }
0x1408   : > { %v2232_v46 = vsel %vm785_vm0, %v2231_v45, 0.0 }
0x1409   : > { %2233 = vadd.xlane.f32.xlu2 %v2232_v46 }
0x147c   : > { %v2234_v22 = vpop.xlane.xlu2 %2233 }
0x147d   : > { %v2235_v49 = vmul.f32 %v2234_v22, %v2881_v8  ;;  %v2645_v8 = vld [vmem:[%s3330_s22] ss:$0 sm:$0xff] }
0x147f   : > { %v2236_v50 = vadd.f32 1e-05, %v2235_v49 }
0x1481   : > { %2703 = vrsqrt.f32 %v2236_v50  ;;  %vm2243_vm13 = vweird.f32 %v2236_v50 }
0x1487   : > { %v2704_v52 = vpop.eup %2703 }
0x1488   : > { %v2238_v30 = vmul.f32 %v2704_v52, %v2236_v50  ;;  %vm2244_vm8 = vweird.f32 %v2704_v52 }
0x1489   : > { %vm2245_vm14 = vmor %vm2243_vm13, %vm2244_vm8 }
0x148a   : > { %v2239_v53 = vmul.f32 %v2704_v52, %v2238_v30 }
0x148c   : > { %v2240_v9 = vmul.f32 0.5, %v2239_v53 }
0x148e   : > { %v2241_v55 = vsub.f32 1.5, %v2240_v9 }
0x1490   : > { %v2242_v56 = vmul.f32 %v2704_v52, %v2241_v55 }
0x1492   : > { %v2246_v59 = vsel %vm2245_vm14, %v2704_v52, %v2242_v56 }
0x1493   : > { %v2247_v60 = vmul.f32 %v2246_v59, %v2230_v44 }
0x1495   : > { %v2251_v61 = vmul.f32 %v2644_v57, %v2247_v60 }
0x1497   : > { %v2255_v54 = vadd.f32 %v2645_v8, %v2251_v61 }
0x1499   : > { %v2260_v58 = vpack.c.bf16 %v2255_v54, %v2255_v54 }
0x149b   : > { %2562 = vmatmul.msk.bf16.vlgmr.msrb.gmra.mxu2 %vm785_vm0, %v2260_v58 }
0x151e   : > { %v2289_v63 = vpop.f32.mrf.mxu2 }
0x151f   : > { %v2290_v48 = vadd.f32 %v2646_v62, %v2289_v63 }
0x1521   : > { %2293 = vst [vmem:[%s773_s7] sm:$0xff] %v2290_v48 }
0x1526   : > { %v2291_v3 = vpop.f32.mrf.mxu2 }
0x1527 PF: > { %s35_s29 = sadd.s32 1, %s2711_s29  }
0x1528   : > { %p32_p4 = scmp.ge.s32.totalorder %s35_s29, 4  }
0x152a   :  { %34 = sbr.rel (!%p32_p4) target bundleno = 11 (0xb), region = 165 }

</bundles_post_ra>
